<compile_context>
chip_gen: v7x
topology: tpu7x:2x2x1
jax: 0.10.0
libtpu: 0.0.40
codegen_flags: <defaults>
</compile_context>

<pallas_src>
import numpy as np
import jax
import jax.numpy as jnp
from jax import lax
from jax.experimental import pallas as pl
from jax.experimental.pallas import tpu as pltpu


# ---------------------------------------------------------------------------
# Host-side constant builders (hoisted out of the kernel body).
# ---------------------------------------------------------------------------
def _boundary_masks(h, w):
    """(4, h, w) multiplicative 0/1 masks for the up/down/left/right shifts."""
    m = np.ones((4, h, w), np.float32)
    m[0, 0, :] = 0.0        # "up" neighbour invalid on the first row
    m[1, h - 1, :] = 0.0    # "down" neighbour invalid on the last row
    m[2, :, 0] = 0.0        # "left" neighbour invalid on the first column
    m[3, :, w - 1] = 0.0    # "right" neighbour invalid on the last column
    return m


def _pool_rows(n):
    """(n//2, n) row-pooling matrix: 0.5 at columns 2r and 2r+1 of row r."""
    p = np.zeros((n // 2, n), np.float32)
    idx = np.arange(n // 2)
    p[idx, 2 * idx] = 0.5
    p[idx, 2 * idx + 1] = 0.5
    return p


# ---------------------------------------------------------------------------
# Fused pyramid kernel: one batch element, all levels, no HBM round trips for
# the downsampled intermediates.
# ---------------------------------------------------------------------------
def _make_kernel(n_levels, n_channels):
    def kernel(x_ref, *refs):
        # refs = [mask_0..mask_{L-1},
        #         pool_rows_0..pool_rows_{L-2},
        #         pool_colsT_0..pool_colsT_{L-2},
        #         lap_0..lap_{L-1}]
        masks = refs[:n_levels]
        pr = refs[n_levels:2 * n_levels - 1]
        pct = refs[2 * n_levels - 1:3 * n_levels - 2]
        laps = refs[3 * n_levels - 2:]

        # Channel sum streamed plane-by-plane: no (C, H, W) f32 temporary.
        s = x_ref[0, 0].astype(jnp.float32)
        for c in range(1, n_channels):
            s = s + x_ref[0, c].astype(jnp.float32)

        for level in range(n_levels):
            h, w = s.shape
            m = masks[level]
            # 4*s - up - down - left - right, zero padding via 0/1 masks.
            up = m[0] * pltpu.roll(s, shift=1, axis=0)
            dn = m[1] * pltpu.roll(s, shift=h - 1, axis=0)
            lf = m[2] * pltpu.roll(s, shift=1, axis=1)
            rt = m[3] * pltpu.roll(s, shift=w - 1, axis=1)
            lap = 4.0 * s - up - dn - lf - rt
            laps[level][0, 0] = lap.astype(laps[level].dtype)

            if level + 1 < n_levels:
                # 2x2 AvgPool(stride 2) of the channel sum (pooling is linear,
                # so pool(sum_c x) == sum_c pool(x)): two small f32 MXU matmuls.
                t = jnp.dot(s, pct[level][...],
                            preferred_element_type=jnp.float32)
                s = jnp.dot(pr[level][...], t,
                            preferred_element_type=jnp.float32)
    return kernel


# ---------------------------------------------------------------------------
# Wrapper: one pallas_call for the whole pyramid, grid over batch only.
# ---------------------------------------------------------------------------
def lap_pyramid(x, n_levels=5):
    """Equivalent of LapPyramid.forward: returns a list of n_levels Laplacians."""
    N, C, H, W = x.shape
    div = 1 << (n_levels - 1)
    assert H % div == 0 and W % div == 0, (
        f"H={H}, W={W} must be divisible by 2**(n_levels-1)={div}")

    # Host-precomputed constants (fetched once per core: constant index_map).
    masks = [jnp.asarray(_boundary_masks(H >> l, W >> l))
             for l in range(n_levels)]
    pool_r = [jnp.asarray(_pool_rows(H >> l)) for l in range(n_levels - 1)]
    pool_ct = [jnp.asarray(np.ascontiguousarray(_pool_rows(W >> l).T))
               for l in range(n_levels - 1)]

    in_specs = [pl.BlockSpec((1, C, H, W), lambda n: (n, 0, 0, 0))]
    in_specs += [pl.BlockSpec(m.shape, lambda n: (0, 0, 0)) for m in masks]
    in_specs += [pl.BlockSpec(p.shape, lambda n: (0, 0)) for p in pool_r]
    in_specs += [pl.BlockSpec(p.shape, lambda n: (0, 0)) for p in pool_ct]

    out_shape = tuple(
        jax.ShapeDtypeStruct((N, 1, H >> l, W >> l), jnp.float32)
        for l in range(n_levels))
    out_specs = tuple(
        pl.BlockSpec((1, 1, H >> l, W >> l), lambda n: (n, 0, 0, 0))
        for l in range(n_levels))

    # Explicit VMEM budget: double-buffered input + outputs, constants (x2 for
    # safety), plus ~8 full-resolution f32 temporaries for the level-0 stencil.
    f32 = 4
    est = 2 * C * H * W * f32
    est += 2 * sum((H >> l) * (W >> l) for l in range(n_levels)) * f32
    est += 2 * sum(4 * (H >> l) * (W >> l) for l in range(n_levels)) * f32
    est += 2 * sum((H >> (l + 1)) * (H >> l) + (W >> l) * (W >> (l + 1))
                   for l in range(n_levels - 1)) * f32
    est += 8 * H * W * f32
    try:
        cap = int(pltpu.get_tpu_info().vmem_capacity_bytes)
    except Exception:
        cap = 64 << 20
    vmem_limit = int(min(max(2 * est, 32 << 20), cap))

    kernel = _make_kernel(n_levels, C)
    laps = pl.pallas_call(
        kernel,
        out_shape=out_shape,
        grid_spec=pltpu.PrefetchScalarGridSpec(
            num_scalar_prefetch=0,
            grid=(N,),
            in_specs=in_specs,
            out_specs=out_specs,
        ),
        compiler_params=pltpu.CompilerParams(
            dimension_semantics=("parallel",),
            vmem_limit_bytes=vmem_limit),
    )(x, *masks, *pool_r, *pool_ct)
    return list(laps)


# ---------------------------------------------------------------------------
# Pure-JAX reference (mirrors the PyTorch module) for verification.
# ---------------------------------------------------------------------------
def ref_lap_pyramid(x, n_levels=5):
    N, C, H, W = x.shape
    k2 = jnp.array([[0, -1, 0], [-1, 4, -1], [0, -1, 0]], jnp.float32)
    kernel = jnp.broadcast_to(k2, (1, C, 3, 3))   # (out=1, in=C, 3, 3)
    laps = []
    for _ in range(n_levels):
        lap = lax.conv_general_dilated(
            x, kernel, window_strides=(1, 1), padding=((1, 1), (1, 1)),
            dimension_numbers=("NCHW", "OIHW", "NCHW"),
            precision=lax.Precision.HIGHEST)
        laps.append(lap)
        n, c, h, w = x.shape
        x = x.reshape(n, c, h // 2, 2, w // 2, 2).mean(axis=(3, 5))
    return laps


if __name__ == "__main__":
    # The module hard-codes 3 input channels (kernel.repeat(1, 3, 1, 1));
    # spatial 32 supports the default n_levels=5 downsamples.
    key = jax.random.PRNGKey(0)
    x = jax.random.normal(key, (2, 3, 32, 32), dtype=jnp.float32)

    laps = lap_pyramid(x, n_levels=5)
    laps = jax.block_until_ready(laps)

    refs = ref_lap_pyramid(x, n_levels=5)
    for got, want in zip(laps, refs):
        np.testing.assert_allclose(np.asarray(got), np.asarray(want),
                                   rtol=1e-5, atol=1e-5)

    print("KERNEL_OK")
</pallas_src>

<mosaic_0001>
module attributes {stable_mosaic.version = 11 : i64} {
  func.func @kernel(%arg0: i32, %arg1: memref<1x3x32x32xf32, #tpu.memory_space<vmem>>, %arg2: memref<4x32x32xf32, #tpu.memory_space<vmem>>, %arg3: memref<4x16x16xf32, #tpu.memory_space<vmem>>, %arg4: memref<4x8x8xf32, #tpu.memory_space<vmem>>, %arg5: memref<4x4x4xf32, #tpu.memory_space<vmem>>, %arg6: memref<4x2x2xf32, #tpu.memory_space<vmem>>, %arg7: memref<16x32xf32, #tpu.memory_space<vmem>>, %arg8: memref<8x16xf32, #tpu.memory_space<vmem>>, %arg9: memref<4x8xf32, #tpu.memory_space<vmem>>, %arg10: memref<2x4xf32, #tpu.memory_space<vmem>>, %arg11: memref<32x16xf32, #tpu.memory_space<vmem>>, %arg12: memref<16x8xf32, #tpu.memory_space<vmem>>, %arg13: memref<8x4xf32, #tpu.memory_space<vmem>>, %arg14: memref<4x2xf32, #tpu.memory_space<vmem>>, %arg15: memref<1x1x32x32xf32, #tpu.memory_space<vmem>>, %arg16: memref<1x1x16x16xf32, #tpu.memory_space<vmem>>, %arg17: memref<1x1x8x8xf32, #tpu.memory_space<vmem>>, %arg18: memref<1x1x4x4xf32, #tpu.memory_space<vmem>>, %arg19: memref<1x1x2x2xf32, #tpu.memory_space<vmem>>) attributes {dimension_semantics = [#tpu.dimension_semantics<parallel>], iteration_bounds = array<i64: 2>, scalar_prefetch = 0 : i64, scratch_operands = 0 : i64, tpu.core_type = #tpu.core_type<tc>, window_params = [{transform_indices = @transform_0, window_bounds = array<i64: 1, 3, 32, 32>}, {pipeline_mode = #tpu.pipeline_mode<synchronous>, transform_indices = @transform_1, window_bounds = array<i64: 4, 32, 32>}, {pipeline_mode = #tpu.pipeline_mode<synchronous>, transform_indices = @transform_2, window_bounds = array<i64: 4, 16, 16>}, {pipeline_mode = #tpu.pipeline_mode<synchronous>, transform_indices = @transform_3, window_bounds = array<i64: 4, 8, 8>}, {pipeline_mode = #tpu.pipeline_mode<synchronous>, transform_indices = @transform_4, window_bounds = array<i64: 4, 4, 4>}, {pipeline_mode = #tpu.pipeline_mode<synchronous>, transform_indices = @transform_5, window_bounds = array<i64: 4, 2, 2>}, {pipeline_mode = #tpu.pipeline_mode<synchronous>, transform_indices = @transform_6, window_bounds = array<i64: 16, 32>}, {pipeline_mode = #tpu.pipeline_mode<synchronous>, transform_indices = @transform_7, window_bounds = array<i64: 8, 16>}, {pipeline_mode = #tpu.pipeline_mode<synchronous>, transform_indices = @transform_8, window_bounds = array<i64: 4, 8>}, {pipeline_mode = #tpu.pipeline_mode<synchronous>, transform_indices = @transform_9, window_bounds = array<i64: 2, 4>}, {pipeline_mode = #tpu.pipeline_mode<synchronous>, transform_indices = @transform_10, window_bounds = array<i64: 32, 16>}, {pipeline_mode = #tpu.pipeline_mode<synchronous>, transform_indices = @transform_11, window_bounds = array<i64: 16, 8>}, {pipeline_mode = #tpu.pipeline_mode<synchronous>, transform_indices = @transform_12, window_bounds = array<i64: 8, 4>}, {pipeline_mode = #tpu.pipeline_mode<synchronous>, transform_indices = @transform_13, window_bounds = array<i64: 4, 2>}, {transform_indices = @transform_14, window_bounds = array<i64: 1, 1, 32, 32>}, {transform_indices = @transform_15, window_bounds = array<i64: 1, 1, 16, 16>}, {transform_indices = @transform_16, window_bounds = array<i64: 1, 1, 8, 8>}, {transform_indices = @transform_17, window_bounds = array<i64: 1, 1, 4, 4>}, {transform_indices = @transform_18, window_bounds = array<i64: 1, 1, 2, 2>}]} {
    %c0 = arith.constant 0 : index
    %c0_0 = arith.constant 0 : index
    %c0_1 = arith.constant 0 : index
    %c0_2 = arith.constant 0 : index
    %0 = vector.load %arg1[%c0, %c0_0, %c0_1, %c0_2] : memref<1x3x32x32xf32, #tpu.memory_space<vmem>>, vector<1x1x32x32xf32>
    %1 = vector.shape_cast %0 : vector<1x1x32x32xf32> to vector<32x32xf32>
    %c0_3 = arith.constant 0 : index
    %c1 = arith.constant 1 : index
    %c0_4 = arith.constant 0 : index
    %c0_5 = arith.constant 0 : index
    %2 = vector.load %arg1[%c0_3, %c1, %c0_4, %c0_5] : memref<1x3x32x32xf32, #tpu.memory_space<vmem>>, vector<1x1x32x32xf32>
    %3 = vector.shape_cast %2 : vector<1x1x32x32xf32> to vector<32x32xf32>
    %4 = arith.addf %1, %3 : vector<32x32xf32>
    %c0_6 = arith.constant 0 : index
    %c2 = arith.constant 2 : index
    %c0_7 = arith.constant 0 : index
    %c0_8 = arith.constant 0 : index
    %5 = vector.load %arg1[%c0_6, %c2, %c0_7, %c0_8] : memref<1x3x32x32xf32, #tpu.memory_space<vmem>>, vector<1x1x32x32xf32>
    %6 = vector.shape_cast %5 : vector<1x1x32x32xf32> to vector<32x32xf32>
    %7 = arith.addf %4, %6 : vector<32x32xf32>
    %c0_9 = arith.constant 0 : index
    %c0_10 = arith.constant 0 : index
    %c0_11 = arith.constant 0 : index
    %8 = vector.load %arg2[%c0_9, %c0_10, %c0_11] : memref<4x32x32xf32, #tpu.memory_space<vmem>>, vector<1x32x32xf32>
    %9 = vector.shape_cast %8 : vector<1x32x32xf32> to vector<32x32xf32>
    %c1_i32 = arith.constant 1 : i32
    %10 = tpu.dynamic_rotate %7 by %c1_i32 dim 0 : vector<32x32xf32>, i32 -> vector<32x32xf32>
    %11 = arith.mulf %9, %10 : vector<32x32xf32>
    %c1_12 = arith.constant 1 : index
    %c0_13 = arith.constant 0 : index
    %c0_14 = arith.constant 0 : index
    %12 = vector.load %arg2[%c1_12, %c0_13, %c0_14] : memref<4x32x32xf32, #tpu.memory_space<vmem>>, vector<1x32x32xf32>
    %13 = vector.shape_cast %12 : vector<1x32x32xf32> to vector<32x32xf32>
    %c31_i32 = arith.constant 31 : i32
    %14 = tpu.dynamic_rotate %7 by %c31_i32 dim 0 : vector<32x32xf32>, i32 -> vector<32x32xf32>
    %15 = arith.mulf %13, %14 : vector<32x32xf32>
    %c2_15 = arith.constant 2 : index
    %c0_16 = arith.constant 0 : index
    %c0_17 = arith.constant 0 : index
    %16 = vector.load %arg2[%c2_15, %c0_16, %c0_17] : memref<4x32x32xf32, #tpu.memory_space<vmem>>, vector<1x32x32xf32>
    %17 = vector.shape_cast %16 : vector<1x32x32xf32> to vector<32x32xf32>
    %c1_i32_18 = arith.constant 1 : i32
    %18 = tpu.dynamic_rotate %7 by %c1_i32_18 dim 1 : vector<32x32xf32>, i32 -> vector<32x32xf32>
    %19 = arith.mulf %17, %18 : vector<32x32xf32>
    %c3 = arith.constant 3 : index
    %c0_19 = arith.constant 0 : index
    %c0_20 = arith.constant 0 : index
    %20 = vector.load %arg2[%c3, %c0_19, %c0_20] : memref<4x32x32xf32, #tpu.memory_space<vmem>>, vector<1x32x32xf32>
    %21 = vector.shape_cast %20 : vector<1x32x32xf32> to vector<32x32xf32>
    %c31_i32_21 = arith.constant 31 : i32
    %22 = tpu.dynamic_rotate %7 by %c31_i32_21 dim 1 : vector<32x32xf32>, i32 -> vector<32x32xf32>
    %23 = arith.mulf %21, %22 : vector<32x32xf32>
    %cst = arith.constant 4.000000e+00 : f32
    %24 = vector.broadcast %cst : f32 to vector<32x32xf32>
    %25 = arith.mulf %24, %7 : vector<32x32xf32>
    %26 = arith.subf %25, %11 : vector<32x32xf32>
    %27 = arith.subf %26, %15 : vector<32x32xf32>
    %28 = arith.subf %27, %19 : vector<32x32xf32>
    %29 = arith.subf %28, %23 : vector<32x32xf32>
    %c0_22 = arith.constant 0 : index
    %c0_23 = arith.constant 0 : index
    %c0_24 = arith.constant 0 : index
    %c0_25 = arith.constant 0 : index
    %30 = vector.load %arg15[%c0_22, %c0_23, %c0_24, %c0_25] : memref<1x1x32x32xf32, #tpu.memory_space<vmem>>, vector<1x1x32x32xf32>
    %31 = vector.shape_cast %30 : vector<1x1x32x32xf32> to vector<32x32xf32>
    %32 = vector.shape_cast %29 : vector<32x32xf32> to vector<1x1x32x32xf32>
    tpu.vector_store %arg15[%c0_22, %c0_23, %c0_24, %c0_25], %32 {strides = array<i32>} : memref<1x1x32x32xf32, #tpu.memory_space<vmem>>, vector<1x1x32x32xf32>,
    %c0_26 = arith.constant 0 : index
    %c0_27 = arith.constant 0 : index
    %33 = vector.load %arg11[%c0_26, %c0_27] : memref<32x16xf32, #tpu.memory_space<vmem>>, vector<32x16xf32>
    %cst_28 = arith.constant dense<0.000000e+00> : vector<32x16xf32>
    %34 = tpu.matmul %7, %33, %cst_28 {dimension_numbers = #tpu.dot_dimension_numbers<[1], [0], [0], [1], [0, 0, 1, 1], [], []>} : vector<32x32xf32>, vector<32x16xf32>, vector<32x16xf32> -> vector<32x16xf32>
    %c0_29 = arith.constant 0 : index
    %c0_30 = arith.constant 0 : index
    %35 = vector.load %arg7[%c0_29, %c0_30] : memref<16x32xf32, #tpu.memory_space<vmem>>, vector<16x32xf32>
    %cst_31 = arith.constant dense<0.000000e+00> : vector<16x16xf32>
    %36 = tpu.matmul %35, %34, %cst_31 {dimension_numbers = #tpu.dot_dimension_numbers<[1], [0], [0], [1], [0, 0, 1, 1], [], []>} : vector<16x32xf32>, vector<32x16xf32>, vector<16x16xf32> -> vector<16x16xf32>
    %c0_32 = arith.constant 0 : index
    %c0_33 = arith.constant 0 : index
    %c0_34 = arith.constant 0 : index
    %37 = vector.load %arg3[%c0_32, %c0_33, %c0_34] : memref<4x16x16xf32, #tpu.memory_space<vmem>>, vector<1x16x16xf32>
    %38 = vector.shape_cast %37 : vector<1x16x16xf32> to vector<16x16xf32>
    %c1_i32_35 = arith.constant 1 : i32
    %39 = tpu.dynamic_rotate %36 by %c1_i32_35 dim 0 : vector<16x16xf32>, i32 -> vector<16x16xf32>
    %40 = arith.mulf %38, %39 : vector<16x16xf32>
    %c1_36 = arith.constant 1 : index
    %c0_37 = arith.constant 0 : index
    %c0_38 = arith.constant 0 : index
    %41 = vector.load %arg3[%c1_36, %c0_37, %c0_38] : memref<4x16x16xf32, #tpu.memory_space<vmem>>, vector<1x16x16xf32>
    %42 = vector.shape_cast %41 : vector<1x16x16xf32> to vector<16x16xf32>
    %c15_i32 = arith.constant 15 : i32
    %43 = tpu.dynamic_rotate %36 by %c15_i32 dim 0 : vector<16x16xf32>, i32 -> vector<16x16xf32>
    %44 = arith.mulf %42, %43 : vector<16x16xf32>
    %c2_39 = arith.constant 2 : index
    %c0_40 = arith.constant 0 : index
    %c0_41 = arith.constant 0 : index
    %45 = vector.load %arg3[%c2_39, %c0_40, %c0_41] : memref<4x16x16xf32, #tpu.memory_space<vmem>>, vector<1x16x16xf32>
    %46 = vector.shape_cast %45 : vector<1x16x16xf32> to vector<16x16xf32>
    %c1_i32_42 = arith.constant 1 : i32
    %47 = tpu.dynamic_rotate %36 by %c1_i32_42 dim 1 : vector<16x16xf32>, i32 -> vector<16x16xf32>
    %48 = arith.mulf %46, %47 : vector<16x16xf32>
    %c3_43 = arith.constant 3 : index
    %c0_44 = arith.constant 0 : index
    %c0_45 = arith.constant 0 : index
    %49 = vector.load %arg3[%c3_43, %c0_44, %c0_45] : memref<4x16x16xf32, #tpu.memory_space<vmem>>, vector<1x16x16xf32>
    %50 = vector.shape_cast %49 : vector<1x16x16xf32> to vector<16x16xf32>
    %c15_i32_46 = arith.constant 15 : i32
    %51 = tpu.dynamic_rotate %36 by %c15_i32_46 dim 1 : vector<16x16xf32>, i32 -> vector<16x16xf32>
    %52 = arith.mulf %50, %51 : vector<16x16xf32>
    %cst_47 = arith.constant 4.000000e+00 : f32
    %53 = vector.broadcast %cst_47 : f32 to vector<16x16xf32>
    %54 = arith.mulf %53, %36 : vector<16x16xf32>
    %55 = arith.subf %54, %40 : vector<16x16xf32>
    %56 = arith.subf %55, %44 : vector<16x16xf32>
    %57 = arith.subf %56, %48 : vector<16x16xf32>
    %58 = arith.subf %57, %52 : vector<16x16xf32>
    %c0_48 = arith.constant 0 : index
    %c0_49 = arith.constant 0 : index
    %c0_50 = arith.constant 0 : index
    %c0_51 = arith.constant 0 : index
    %59 = vector.load %arg16[%c0_48, %c0_49, %c0_50, %c0_51] : memref<1x1x16x16xf32, #tpu.memory_space<vmem>>, vector<1x1x16x16xf32>
    %60 = vector.shape_cast %59 : vector<1x1x16x16xf32> to vector<16x16xf32>
    %61 = vector.shape_cast %58 : vector<16x16xf32> to vector<1x1x16x16xf32>
    tpu.vector_store %arg16[%c0_48, %c0_49, %c0_50, %c0_51], %61 {strides = array<i32>} : memref<1x1x16x16xf32, #tpu.memory_space<vmem>>, vector<1x1x16x16xf32>,
    %c0_52 = arith.constant 0 : index
    %c0_53 = arith.constant 0 : index
    %62 = vector.load %arg12[%c0_52, %c0_53] : memref<16x8xf32, #tpu.memory_space<vmem>>, vector<16x8xf32>
    %cst_54 = arith.constant dense<0.000000e+00> : vector<16x8xf32>
    %63 = tpu.matmul %36, %62, %cst_54 {dimension_numbers = #tpu.dot_dimension_numbers<[1], [0], [0], [1], [0, 0, 1, 1], [], []>} : vector<16x16xf32>, vector<16x8xf32>, vector<16x8xf32> -> vector<16x8xf32>
    %c0_55 = arith.constant 0 : index
    %c0_56 = arith.constant 0 : index
    %64 = vector.load %arg8[%c0_55, %c0_56] : memref<8x16xf32, #tpu.memory_space<vmem>>, vector<8x16xf32>
    %cst_57 = arith.constant dense<0.000000e+00> : vector<8x8xf32>
    %65 = tpu.matmul %64, %63, %cst_57 {dimension_numbers = #tpu.dot_dimension_numbers<[1], [0], [0], [1], [0, 0, 1, 1], [], []>} : vector<8x16xf32>, vector<16x8xf32>, vector<8x8xf32> -> vector<8x8xf32>
    %c0_58 = arith.constant 0 : index
    %c0_59 = arith.constant 0 : index
    %c0_60 = arith.constant 0 : index
    %66 = vector.load %arg4[%c0_58, %c0_59, %c0_60] : memref<4x8x8xf32, #tpu.memory_space<vmem>>, vector<1x8x8xf32>
    %67 = vector.shape_cast %66 : vector<1x8x8xf32> to vector<8x8xf32>
    %c1_i32_61 = arith.constant 1 : i32
    %68 = tpu.dynamic_rotate %65 by %c1_i32_61 dim 0 : vector<8x8xf32>, i32 -> vector<8x8xf32>
    %69 = arith.mulf %67, %68 : vector<8x8xf32>
    %c1_62 = arith.constant 1 : index
    %c0_63 = arith.constant 0 : index
    %c0_64 = arith.constant 0 : index
    %70 = vector.load %arg4[%c1_62, %c0_63, %c0_64] : memref<4x8x8xf32, #tpu.memory_space<vmem>>, vector<1x8x8xf32>
    %71 = vector.shape_cast %70 : vector<1x8x8xf32> to vector<8x8xf32>
    %c7_i32 = arith.constant 7 : i32
    %72 = tpu.dynamic_rotate %65 by %c7_i32 dim 0 : vector<8x8xf32>, i32 -> vector<8x8xf32>
    %73 = arith.mulf %71, %72 : vector<8x8xf32>
    %c2_65 = arith.constant 2 : index
    %c0_66 = arith.constant 0 : index
    %c0_67 = arith.constant 0 : index
    %74 = vector.load %arg4[%c2_65, %c0_66, %c0_67] : memref<4x8x8xf32, #tpu.memory_space<vmem>>, vector<1x8x8xf32>
    %75 = vector.shape_cast %74 : vector<1x8x8xf32> to vector<8x8xf32>
    %c1_i32_68 = arith.constant 1 : i32
    %76 = tpu.dynamic_rotate %65 by %c1_i32_68 dim 1 : vector<8x8xf32>, i32 -> vector<8x8xf32>
    %77 = arith.mulf %75, %76 : vector<8x8xf32>
    %c3_69 = arith.constant 3 : index
    %c0_70 = arith.constant 0 : index
    %c0_71 = arith.constant 0 : index
    %78 = vector.load %arg4[%c3_69, %c0_70, %c0_71] : memref<4x8x8xf32, #tpu.memory_space<vmem>>, vector<1x8x8xf32>
    %79 = vector.shape_cast %78 : vector<1x8x8xf32> to vector<8x8xf32>
    %c7_i32_72 = arith.constant 7 : i32
    %80 = tpu.dynamic_rotate %65 by %c7_i32_72 dim 1 : vector<8x8xf32>, i32 -> vector<8x8xf32>
    %81 = arith.mulf %79, %80 : vector<8x8xf32>
    %cst_73 = arith.constant 4.000000e+00 : f32
    %82 = vector.broadcast %cst_73 : f32 to vector<8x8xf32>
    %83 = arith.mulf %82, %65 : vector<8x8xf32>
    %84 = arith.subf %83, %69 : vector<8x8xf32>
    %85 = arith.subf %84, %73 : vector<8x8xf32>
    %86 = arith.subf %85, %77 : vector<8x8xf32>
    %87 = arith.subf %86, %81 : vector<8x8xf32>
    %c0_74 = arith.constant 0 : index
    %c0_75 = arith.constant 0 : index
    %c0_76 = arith.constant 0 : index
    %c0_77 = arith.constant 0 : index
    %88 = vector.load %arg17[%c0_74, %c0_75, %c0_76, %c0_77] : memref<1x1x8x8xf32, #tpu.memory_space<vmem>>, vector<1x1x8x8xf32>
    %89 = vector.shape_cast %88 : vector<1x1x8x8xf32> to vector<8x8xf32>
    %90 = vector.shape_cast %87 : vector<8x8xf32> to vector<1x1x8x8xf32>
    tpu.vector_store %arg17[%c0_74, %c0_75, %c0_76, %c0_77], %90 {strides = array<i32>} : memref<1x1x8x8xf32, #tpu.memory_space<vmem>>, vector<1x1x8x8xf32>,
    %c0_78 = arith.constant 0 : index
    %c0_79 = arith.constant 0 : index
    %91 = vector.load %arg13[%c0_78, %c0_79] : memref<8x4xf32, #tpu.memory_space<vmem>>, vector<8x4xf32>
    %cst_80 = arith.constant dense<0.000000e+00> : vector<8x4xf32>
    %92 = tpu.matmul %65, %91, %cst_80 {dimension_numbers = #tpu.dot_dimension_numbers<[1], [0], [0], [1], [0, 0, 1, 1], [], []>} : vector<8x8xf32>, vector<8x4xf32>, vector<8x4xf32> -> vector<8x4xf32>
    %c0_81 = arith.constant 0 : index
    %c0_82 = arith.constant 0 : index
    %93 = vector.load %arg9[%c0_81, %c0_82] : memref<4x8xf32, #tpu.memory_space<vmem>>, vector<4x8xf32>
    %cst_83 = arith.constant dense<0.000000e+00> : vector<4x4xf32>
    %94 = tpu.matmul %93, %92, %cst_83 {dimension_numbers = #tpu.dot_dimension_numbers<[1], [0], [0], [1], [0, 0, 1, 1], [], []>} : vector<4x8xf32>, vector<8x4xf32>, vector<4x4xf32> -> vector<4x4xf32>
    %c0_84 = arith.constant 0 : index
    %c0_85 = arith.constant 0 : index
    %c0_86 = arith.constant 0 : index
    %95 = vector.load %arg5[%c0_84, %c0_85, %c0_86] : memref<4x4x4xf32, #tpu.memory_space<vmem>>, vector<1x4x4xf32>
    %96 = vector.shape_cast %95 : vector<1x4x4xf32> to vector<4x4xf32>
    %c1_i32_87 = arith.constant 1 : i32
    %97 = tpu.dynamic_rotate %94 by %c1_i32_87 dim 0 : vector<4x4xf32>, i32 -> vector<4x4xf32>
    %98 = arith.mulf %96, %97 : vector<4x4xf32>
    %c1_88 = arith.constant 1 : index
    %c0_89 = arith.constant 0 : index
    %c0_90 = arith.constant 0 : index
    %99 = vector.load %arg5[%c1_88, %c0_89, %c0_90] : memref<4x4x4xf32, #tpu.memory_space<vmem>>, vector<1x4x4xf32>
    %100 = vector.shape_cast %99 : vector<1x4x4xf32> to vector<4x4xf32>
    %c3_i32 = arith.constant 3 : i32
    %101 = tpu.dynamic_rotate %94 by %c3_i32 dim 0 : vector<4x4xf32>, i32 -> vector<4x4xf32>
    %102 = arith.mulf %100, %101 : vector<4x4xf32>
    %c2_91 = arith.constant 2 : index
    %c0_92 = arith.constant 0 : index
    %c0_93 = arith.constant 0 : index
    %103 = vector.load %arg5[%c2_91, %c0_92, %c0_93] : memref<4x4x4xf32, #tpu.memory_space<vmem>>, vector<1x4x4xf32>
    %104 = vector.shape_cast %103 : vector<1x4x4xf32> to vector<4x4xf32>
    %c1_i32_94 = arith.constant 1 : i32
    %105 = tpu.dynamic_rotate %94 by %c1_i32_94 dim 1 : vector<4x4xf32>, i32 -> vector<4x4xf32>
    %106 = arith.mulf %104, %105 : vector<4x4xf32>
    %c3_95 = arith.constant 3 : index
    %c0_96 = arith.constant 0 : index
    %c0_97 = arith.constant 0 : index
    %107 = vector.load %arg5[%c3_95, %c0_96, %c0_97] : memref<4x4x4xf32, #tpu.memory_space<vmem>>, vector<1x4x4xf32>
    %108 = vector.shape_cast %107 : vector<1x4x4xf32> to vector<4x4xf32>
    %c3_i32_98 = arith.constant 3 : i32
    %109 = tpu.dynamic_rotate %94 by %c3_i32_98 dim 1 : vector<4x4xf32>, i32 -> vector<4x4xf32>
    %110 = arith.mulf %108, %109 : vector<4x4xf32>
    %cst_99 = arith.constant 4.000000e+00 : f32
    %111 = vector.broadcast %cst_99 : f32 to vector<4x4xf32>
    %112 = arith.mulf %111, %94 : vector<4x4xf32>
    %113 = arith.subf %112, %98 : vector<4x4xf32>
    %114 = arith.subf %113, %102 : vector<4x4xf32>
    %115 = arith.subf %114, %106 : vector<4x4xf32>
    %116 = arith.subf %115, %110 : vector<4x4xf32>
    %c0_100 = arith.constant 0 : index
    %c0_101 = arith.constant 0 : index
    %c0_102 = arith.constant 0 : index
    %c0_103 = arith.constant 0 : index
    %117 = vector.load %arg18[%c0_100, %c0_101, %c0_102, %c0_103] : memref<1x1x4x4xf32, #tpu.memory_space<vmem>>, vector<1x1x4x4xf32>
    %118 = vector.shape_cast %117 : vector<1x1x4x4xf32> to vector<4x4xf32>
    %119 = vector.shape_cast %116 : vector<4x4xf32> to vector<1x1x4x4xf32>
    tpu.vector_store %arg18[%c0_100, %c0_101, %c0_102, %c0_103], %119 {strides = array<i32>} : memref<1x1x4x4xf32, #tpu.memory_space<vmem>>, vector<1x1x4x4xf32>,
    %c0_104 = arith.constant 0 : index
    %c0_105 = arith.constant 0 : index
    %120 = vector.load %arg14[%c0_104, %c0_105] : memref<4x2xf32, #tpu.memory_space<vmem>>, vector<4x2xf32>
    %cst_106 = arith.constant dense<0.000000e+00> : vector<4x2xf32>
    %121 = tpu.matmul %94, %120, %cst_106 {dimension_numbers = #tpu.dot_dimension_numbers<[1], [0], [0], [1], [0, 0, 1, 1], [], []>} : vector<4x4xf32>, vector<4x2xf32>, vector<4x2xf32> -> vector<4x2xf32>
    %c0_107 = arith.constant 0 : index
    %c0_108 = arith.constant 0 : index
    %122 = vector.load %arg10[%c0_107, %c0_108] : memref<2x4xf32, #tpu.memory_space<vmem>>, vector<2x4xf32>
    %cst_109 = arith.constant dense<0.000000e+00> : vector<2x2xf32>
    %123 = tpu.matmul %122, %121, %cst_109 {dimension_numbers = #tpu.dot_dimension_numbers<[1], [0], [0], [1], [0, 0, 1, 1], [], []>} : vector<2x4xf32>, vector<4x2xf32>, vector<2x2xf32> -> vector<2x2xf32>
    %c0_110 = arith.constant 0 : index
    %c0_111 = arith.constant 0 : index
    %c0_112 = arith.constant 0 : index
    %124 = vector.load %arg6[%c0_110, %c0_111, %c0_112] : memref<4x2x2xf32, #tpu.memory_space<vmem>>, vector<1x2x2xf32>
    %125 = vector.shape_cast %124 : vector<1x2x2xf32> to vector<2x2xf32>
    %c1_i32_113 = arith.constant 1 : i32
    %126 = tpu.dynamic_rotate %123 by %c1_i32_113 dim 0 : vector<2x2xf32>, i32 -> vector<2x2xf32>
    %127 = arith.mulf %125, %126 : vector<2x2xf32>
    %c1_114 = arith.constant 1 : index
    %c0_115 = arith.constant 0 : index
    %c0_116 = arith.constant 0 : index
    %128 = vector.load %arg6[%c1_114, %c0_115, %c0_116] : memref<4x2x2xf32, #tpu.memory_space<vmem>>, vector<1x2x2xf32>
    %129 = vector.shape_cast %128 : vector<1x2x2xf32> to vector<2x2xf32>
    %c1_i32_117 = arith.constant 1 : i32
    %130 = tpu.dynamic_rotate %123 by %c1_i32_117 dim 0 : vector<2x2xf32>, i32 -> vector<2x2xf32>
    %131 = arith.mulf %129, %130 : vector<2x2xf32>
    %c2_118 = arith.constant 2 : index
    %c0_119 = arith.constant 0 : index
    %c0_120 = arith.constant 0 : index
    %132 = vector.load %arg6[%c2_118, %c0_119, %c0_120] : memref<4x2x2xf32, #tpu.memory_space<vmem>>, vector<1x2x2xf32>
    %133 = vector.shape_cast %132 : vector<1x2x2xf32> to vector<2x2xf32>
    %c1_i32_121 = arith.constant 1 : i32
    %134 = tpu.dynamic_rotate %123 by %c1_i32_121 dim 1 : vector<2x2xf32>, i32 -> vector<2x2xf32>
    %135 = arith.mulf %133, %134 : vector<2x2xf32>
    %c3_122 = arith.constant 3 : index
    %c0_123 = arith.constant 0 : index
    %c0_124 = arith.constant 0 : index
    %136 = vector.load %arg6[%c3_122, %c0_123, %c0_124] : memref<4x2x2xf32, #tpu.memory_space<vmem>>, vector<1x2x2xf32>
    %137 = vector.shape_cast %136 : vector<1x2x2xf32> to vector<2x2xf32>
    %c1_i32_125 = arith.constant 1 : i32
    %138 = tpu.dynamic_rotate %123 by %c1_i32_125 dim 1 : vector<2x2xf32>, i32 -> vector<2x2xf32>
    %139 = arith.mulf %137, %138 : vector<2x2xf32>
    %cst_126 = arith.constant 4.000000e+00 : f32
    %140 = vector.broadcast %cst_126 : f32 to vector<2x2xf32>
    %141 = arith.mulf %140, %123 : vector<2x2xf32>
    %142 = arith.subf %141, %127 : vector<2x2xf32>
    %143 = arith.subf %142, %131 : vector<2x2xf32>
    %144 = arith.subf %143, %135 : vector<2x2xf32>
    %145 = arith.subf %144, %139 : vector<2x2xf32>
    %c0_127 = arith.constant 0 : index
    %c0_128 = arith.constant 0 : index
    %c0_129 = arith.constant 0 : index
    %c0_130 = arith.constant 0 : index
    %146 = vector.load %arg19[%c0_127, %c0_128, %c0_129, %c0_130] : memref<1x1x2x2xf32, #tpu.memory_space<vmem>>, vector<1x1x2x2xf32>
    %147 = vector.shape_cast %146 : vector<1x1x2x2xf32> to vector<2x2xf32>
    %148 = vector.shape_cast %145 : vector<2x2xf32> to vector<1x1x2x2xf32>
    tpu.vector_store %arg19[%c0_127, %c0_128, %c0_129, %c0_130], %148 {strides = array<i32>} : memref<1x1x2x2xf32, #tpu.memory_space<vmem>>, vector<1x1x2x2xf32>,
    return
  }
  func.func @transform_0(%arg0: i32) -> (i32, i32, i32, i32) {
    %c0_i32 = arith.constant 0 : i32
    %c0_i32_0 = arith.constant 0 : i32
    %c0_i32_1 = arith.constant 0 : i32
    %c0_i32_2 = arith.constant 0 : i32
    return %arg0, %c0_i32, %c0_i32_0, %c0_i32_1 : i32, i32, i32, i32
  }
  func.func @transform_1(%arg0: i32) -> (i32, i32, i32) {
    %c0_i32 = arith.constant 0 : i32
    %c0_i32_0 = arith.constant 0 : i32
    %c0_i32_1 = arith.constant 0 : i32
    %c0_i32_2 = arith.constant 0 : i32
    return %c0_i32, %c0_i32_0, %c0_i32_1 : i32, i32, i32
  }
  func.func @transform_2(%arg0: i32) -> (i32, i32, i32) {
    %c0_i32 = arith.constant 0 : i32
    %c0_i32_0 = arith.constant 0 : i32
    %c0_i32_1 = arith.constant 0 : i32
    %c0_i32_2 = arith.constant 0 : i32
    return %c0_i32, %c0_i32_0, %c0_i32_1 : i32, i32, i32
  }
  func.func @transform_3(%arg0: i32) -> (i32, i32, i32) {
    %c0_i32 = arith.constant 0 : i32
    %c0_i32_0 = arith.constant 0 : i32
    %c0_i32_1 = arith.constant 0 : i32
    %c0_i32_2 = arith.constant 0 : i32
    return %c0_i32, %c0_i32_0, %c0_i32_1 : i32, i32, i32
  }
  func.func @transform_4(%arg0: i32) -> (i32, i32, i32) {
    %c0_i32 = arith.constant 0 : i32
    %c0_i32_0 = arith.constant 0 : i32
    %c0_i32_1 = arith.constant 0 : i32
    %c0_i32_2 = arith.constant 0 : i32
    return %c0_i32, %c0_i32_0, %c0_i32_1 : i32, i32, i32
  }
  func.func @transform_5(%arg0: i32) -> (i32, i32, i32) {
    %c0_i32 = arith.constant 0 : i32
    %c0_i32_0 = arith.constant 0 : i32
    %c0_i32_1 = arith.constant 0 : i32
    %c0_i32_2 = arith.constant 0 : i32
    return %c0_i32, %c0_i32_0, %c0_i32_1 : i32, i32, i32
  }
  func.func @transform_6(%arg0: i32) -> (i32, i32) {
    %c0_i32 = arith.constant 0 : i32
    %c0_i32_0 = arith.constant 0 : i32
    %c0_i32_1 = arith.constant 0 : i32
    return %c0_i32, %c0_i32_0 : i32, i32
  }
  func.func @transform_7(%arg0: i32) -> (i32, i32) {
    %c0_i32 = arith.constant 0 : i32
    %c0_i32_0 = arith.constant 0 : i32
    %c0_i32_1 = arith.constant 0 : i32
    return %c0_i32, %c0_i32_0 : i32, i32
  }
  func.func @transform_8(%arg0: i32) -> (i32, i32) {
    %c0_i32 = arith.constant 0 : i32
    %c0_i32_0 = arith.constant 0 : i32
    %c0_i32_1 = arith.constant 0 : i32
    return %c0_i32, %c0_i32_0 : i32, i32
  }
  func.func @transform_9(%arg0: i32) -> (i32, i32) {
    %c0_i32 = arith.constant 0 : i32
    %c0_i32_0 = arith.constant 0 : i32
    %c0_i32_1 = arith.constant 0 : i32
    return %c0_i32, %c0_i32_0 : i32, i32
  }
  func.func @transform_10(%arg0: i32) -> (i32, i32) {
    %c0_i32 = arith.constant 0 : i32
    %c0_i32_0 = arith.constant 0 : i32
    %c0_i32_1 = arith.constant 0 : i32
    return %c0_i32, %c0_i32_0 : i32, i32
  }
  func.func @transform_11(%arg0: i32) -> (i32, i32) {
    %c0_i32 = arith.constant 0 : i32
    %c0_i32_0 = arith.constant 0 : i32
    %c0_i32_1 = arith.constant 0 : i32
    return %c0_i32, %c0_i32_0 : i32, i32
  }
  func.func @transform_12(%arg0: i32) -> (i32, i32) {
    %c0_i32 = arith.constant 0 : i32
    %c0_i32_0 = arith.constant 0 : i32
    %c0_i32_1 = arith.constant 0 : i32
    return %c0_i32, %c0_i32_0 : i32, i32
  }
  func.func @transform_13(%arg0: i32) -> (i32, i32) {
    %c0_i32 = arith.constant 0 : i32
    %c0_i32_0 = arith.constant 0 : i32
    %c0_i32_1 = arith.constant 0 : i32
    return %c0_i32, %c0_i32_0 : i32, i32
  }
  func.func @transform_14(%arg0: i32) -> (i32, i32, i32, i32) {
    %c0_i32 = arith.constant 0 : i32
    %c0_i32_0 = arith.constant 0 : i32
    %c0_i32_1 = arith.constant 0 : i32
    %c0_i32_2 = arith.constant 0 : i32
    return %arg0, %c0_i32, %c0_i32_0, %c0_i32_1 : i32, i32, i32, i32
  }
  func.func @transform_15(%arg0: i32) -> (i32, i32, i32, i32) {
    %c0_i32 = arith.constant 0 : i32
    %c0_i32_0 = arith.constant 0 : i32
    %c0_i32_1 = arith.constant 0 : i32
    %c0_i32_2 = arith.constant 0 : i32
    return %arg0, %c0_i32, %c0_i32_0, %c0_i32_1 : i32, i32, i32, i32
  }
  func.func @transform_16(%arg0: i32) -> (i32, i32, i32, i32) {
    %c0_i32 = arith.constant 0 : i32
    %c0_i32_0 = arith.constant 0 : i32
    %c0_i32_1 = arith.constant 0 : i32
    %c0_i32_2 = arith.constant 0 : i32
    return %arg0, %c0_i32, %c0_i32_0, %c0_i32_1 : i32, i32, i32, i32
  }
  func.func @transform_17(%arg0: i32) -> (i32, i32, i32, i32) {
    %c0_i32 = arith.constant 0 : i32
    %c0_i32_0 = arith.constant 0 : i32
    %c0_i32_1 = arith.constant 0 : i32
    %c0_i32_2 = arith.constant 0 : i32
    return %arg0, %c0_i32, %c0_i32_0, %c0_i32_1 : i32, i32, i32, i32
  }
  func.func @transform_18(%arg0: i32) -> (i32, i32, i32, i32) {
    %c0_i32 = arith.constant 0 : i32
    %c0_i32_0 = arith.constant 0 : i32
    %c0_i32_1 = arith.constant 0 : i32
    %c0_i32_2 = arith.constant 0 : i32
    return %arg0, %c0_i32, %c0_i32_0, %c0_i32_1 : i32, i32, i32, i32
  }
}

</mosaic_0001>

<bundles_post_ra>
// kernel: tpu_custom_call.1
= control target key start
LH: loop header
LB: loop body
LE: loop exit
PB: predicated region body
PF: predicated region fallthrough
CT: control target
= control target key end

     0   :  { %s3545_s0 = inlined_call_operand.hbm [shape: f32[2,3,32,32], index: 0, kind: input, shape index: {}]   ;;  %s3546_s1 = inlined_call_operand.hbm [shape: f32[4,32,32], index: 1, kind: input, shape index: {}]   ;;  %s3547_s2 = inlined_call_operand.vmem [shape: f32[4,16,16], index: 2, kind: input, shape index: {}]   ;;  %s3548_s3 = inlined_call_operand.vmem [shape: f32[4,8,8], index: 3, kind: input, shape index: {}]   ;;  %s3549_s4 = inlined_call_operand.hbm [shape: f32[4,4,4], index: 4, kind: input, shape index: {}]   ;;  %s3550_s5 = inlined_call_operand.vmem [shape: f32[4,2,2], index: 5, kind: input, shape index: {}]   ;;  %s3551_s6 = inlined_call_operand.hbm [shape: f32[16,32], index: 6, kind: input, shape index: {}]   ;;  %s3552_s7 = inlined_call_operand.vmem [shape: f32[8,16], index: 7, kind: input, shape index: {}]   ;;  %s3553_s8 = inlined_call_operand.vmem [shape: f32[4,8], index: 8, kind: input, shape index: {}]   ;;  %s3554_s9 = inlined_call_operand.hbm [shape: f32[2,4], index: 9, kind: input, shape index: {}]   ;;  %s3555_s10 = inlined_call_operand.vmem [shape: f32[32,16], index: 10, kind: input, shape index: {}]   ;;  %s3556_s11 = inlined_call_operand.vmem [shape: f32[16,8], index: 11, kind: input, shape index: {}]   ;;  %s3557_s12 = inlined_call_operand.vmem [shape: f32[8,4], index: 12, kind: input, shape index: {}]   ;;  %s3558_s13 = inlined_call_operand.vmem [shape: f32[4,2], index: 13, kind: input, shape index: {}]   ;;  %s3559_s14 = inlined_call_operand.hbm [shape: f32[2,1,32,32], index: 14, kind: output, shape index: {0}]   ;;  %s3560_s15 = inlined_call_operand.hbm [shape: f32[2,1,16,16], index: 15, kind: output, shape index: {1}]   ;;  %s3561_s16 = inlined_call_operand.hbm [shape: f32[2,1,8,8], index: 16, kind: output, shape index: {2}]   ;;  %s3562_s17 = inlined_call_operand.hbm [shape: f32[2,1,4,4], index: 17, kind: output, shape index: {3}]   ;;  %s3563_s18 = inlined_call_operand.hbm [shape: f32[2,1,2,2], index: 18, kind: output, shape index: {4}]  }
   0x1   :  { %3590 = sst [smem:[#allocation26_spill]] %s3545_s0 }
   0x2   :  { %3591 = sst [smem:[#allocation27_spill]] %s3546_s1 }
   0x3   :  { %3592 = sst [smem:[#allocation28_spill]] %s3547_s2 }
   0x4   :  { %3593 = sst [smem:[#allocation29_spill]] %s3548_s3 }
   0x5   :  { %3594 = sst [smem:[#allocation30_spill]] %s3549_s4 }
   0x6   :  { %3595 = sst [smem:[#allocation31_spill]] %s3550_s5 }
   0x7   :  { %3596 = sst [smem:[#allocation32_spill]] %s3551_s6 }
   0x8   :  { %3597 = sst [smem:[#allocation33_spill]] %s3552_s7 }
   0x9   :  { %3598 = sst [smem:[#allocation34_spill]] %s3558_s13 }
   0xa   :  { %3599 = sst [smem:[#allocation35_spill]] %s3559_s14 }
   0xb   :  { %3600 = sst [smem:[#allocation36_spill]] %s3560_s15 }
   0xc   :  { %3601 = sst [smem:[#allocation37_spill]] %s3561_s16 }
   0xd   :  { %3602 = sst [smem:[#allocation38_spill]] %s3562_s17 }
   0xe   :  { %3603 = sst [smem:[#allocation39_spill]] %s3563_s18 }
   0xf   :  { %24 = vsyncpa [#allocation3], 0 }
  0x10   :  { %26 = vsyncpa [#allocation3 + $0x1], 0 }
  0x11   :  { %27 = vsyncpa [#allocation6], 0 }
  0x12   :  { %28 = vsyncpa [#allocation9], 0 }
  0x13   :  { %29 = vsyncpa [#allocation4], 0 }
  0x14   :  { %31 = vsyncpa [#allocation4 + $0x1], 0 }
  0x15   :  { %32 = vsyncpa [#allocation13], 0 }
  0x16   :  { %34 = vsyncpa [#allocation13 + $0x1], 0 }
  0x17   :  { %35 = vsyncpa [#allocation16], 0 }
  0x18   :  { %37 = vsyncpa [#allocation16 + $0x1], 0  ;;  %s2756_s27 = smov 0   ;;  %s2758_s28 = smov 0  }
  0x19   :  { %s2760_s29 = smov 0   ;;  %s2762_s30 = smov 0  }
  0x1a LB: > { %3604 = sst [smem:[#allocation24_spill]] %s2619_s27  ;;  %s2777_s0 = sadd.s32 4294967295, %s2631_s30   ;;  %s2631_s30 = sphi %s2762_s30, %s3651_s30   ;;  %s2627_s29 = sphi %s2760_s29, %s3650_s29   ;;  %s2623_s28 = sphi %s2758_s28, %s3649_s28   ;;  %s2619_s27 = sphi %s2756_s27, %s3648_s27  }
  0x1b   : > { %s3567_s19 = sadd.s32 4294967294, %s2631_s30   ;;  %p63_p0 = scmp.ne.s32.totalorder %s2623_s28, %s2619_s27 }
  0x1c   : > { %p3575_p1 = scmp.eq.s32.totalorder %s2777_s0, 0  ;;  %p366_p3 = scmp.eq.s32.totalorder %s3567_s19, 1 }
  0x1d   : > { %p1988_p5 = scmp.ge.s32.totalorder %s2631_s30, 1  ;;  %p477_p7 = scmp.lt.s32.totalorder %s2631_s30, 3 }
  0x1e   : > { %p2788_p4 = por %p3575_p1, %p63_p0  ;;  %p2793_p6 = por %p366_p3, %p63_p0 }
  0x1f   : > { %p2798_p8 = pnand %p1988_p5, %p477_p7  ;;  %s2633_s22 = smov [#allocation5]  }
  0x20   : > { %s3605_s1 = scalar_select %p2788_p4, 1, 0 }
  0x21   : > { %s3606_s20 = scalar_select %p2793_p6, 1, 0 }
  0x22   : > { %s3608_s21 = scalar_select %p2798_p8, 1, 0 }
  0x23   : > { %3607 = sst [smem:[#allocation25_spill]] %s3606_s20  ;;  %s489_s2 = sshll.u32 %s2633_s22, 4  ;;  %s2802_s2 = int_to_ptr.vmem [resolvable:$true] %s489_s2 }
  0x24   : > { %p2198_p9 = pneg %p2798_p8  ;;  %s2634_s24 = smov [#allocation8]  }
  0x25   : > { %s524_s25 = sshll.u32 %s2634_s24, 4  ;;  %s2635_s26 = smov [#allocation7]   ;;  %s2813_s25 = int_to_ptr.vmem [resolvable:$true] %s524_s25 }
  0x26   : > { %p2809_p11 = pnand %p2198_p9, %p3575_p1  ;;  %s2815_s19 = sshll.u32 %s2635_s26, 4  ;;  %s509_s19 = int_to_ptr.vmem [resolvable:$true] %s2815_s19 }
  0x27   : > { %s3610_s27 = sld [smem:[#allocation27_spill]] }
  0x28   : > { %p2825_p13 = pneg %p2809_p11 }
  0x2d   : > { %s3611_s16 = smov %s3610_s27  ;;  %s2295_s18 = scalar_lea.hbm %s3610_s27, 2048 }
  0x2e   : > { %p2296_p12 = scmp.ne.s32.totalorder %s3611_s16, %s2295_s18  ;;  %p2302_p5 = scmp.lt.u32.totalorder %s2295_s18, %s3611_s16 }
  0x30   : > { %p2298_p0 = pnand %p2825_p13, %p2296_p12 }
  0x32   : > { %p2299_p3 = pneg %p2298_p0 }
  0x34   : > { %p2304_p7 = pnand %p2302_p5, %p2299_p3 }
  0x36   : > { %2307 = shalt.err (!%p2304_p7)
}
  0x37   : > { %s2308_s5 = scalar_lea.vmem %s2802_s2, 2048  ;;  %p2316_p2 = scmp.lt.s32.totalorder %s2802_s2, %s2802_s2 }
  0x38   : > { %p2309_p9 = scmp.ne.s32.totalorder %s2802_s2, %s2308_s5  ;;  %p2317_p6 = scmp.lt.s32.totalorder %s2308_s5, %s2308_s5 }
  0x3a   : > { %p2311_p10 = pnand %p2309_p9, %p2825_p13  ;;  %p2318_p12 = por %p2317_p6, %p2316_p2 }
  0x3c   : > { %p2312_p1 = pneg %p2311_p10 }
  0x3e   : > { %p2319_p0 = pnand %p2318_p12, %p2312_p1 }
  0x40   : > { %2322 = shalt.err (!%p2319_p0)
}
  0x41   : > { %s3580_s14 = smov 128   ;;  %s3581_s18 = smov 8  }
  0x42   : > { %2201 = dma.hbm_to_vmem [thread:$0]  (!%p2809_p11), %s3611_s16, 2048, %s2802_s2, [#allocation6], %s3580_s14, %s3580_s14, %s3581_s18  }
  0x43   : > { %s3613_s6 = sld [smem:[#allocation32_spill]] }
  0x49   : > { %s2323_s26 = scalar_lea.hbm %s3613_s6, 256 }
  0x4a   : > { %p2324_p1 = scmp.ne.s32.totalorder %s3613_s6, %s2323_s26  ;;  %p2330_p10 = scmp.lt.u32.totalorder %s2323_s26, %s3613_s6 }
  0x4c   : > { %p2326_p2 = pnand %p2324_p1, %p2825_p13 }
  0x4e   : > { %p2327_p6 = pneg %p2326_p2 }
  0x50   : > { %p2332_p3 = pnand %p2330_p10, %p2327_p6 }
  0x52   : > { %2335 = shalt.err (!%p2332_p3)
}
  0x53   : > { %s2336_s2 = scalar_lea.vmem %s2813_s25, 256  ;;  %p2344_p12 = scmp.lt.s32.totalorder %s2813_s25, %s2813_s25 }
  0x54   : > { %p2337_p5 = scmp.ne.s32.totalorder %s2813_s25, %s2336_s2  ;;  %p2345_p0 = scmp.lt.s32.totalorder %s2336_s2, %s2336_s2 }
  0x56   : > { %p2339_p7 = pnand %p2337_p5, %p2825_p13  ;;  %p2346_p1 = por %p2345_p0, %p2344_p12 }
  0x58   : > { %p2340_p9 = pneg %p2339_p7 }
  0x5a   : > { %p2347_p2 = pnand %p2346_p1, %p2340_p9 }
  0x5c   : > { %2350 = shalt.err (!%p2347_p2)
}
  0x5d   : > { %2207 = dma.hbm_to_vmem [thread:$0]  (!%p2809_p11), %s3613_s6, 256, %s2813_s25, [#allocation9], %s3580_s14, %s3580_s14, %s3581_s18  }
  0x5e   : > { %s3614_s4 = sld [smem:[#allocation30_spill]] }
  0x64   : > { %s2351_s20 = scalar_lea.hbm %s3614_s4, 256 }
  0x65   : > { %p2352_p6 = scmp.ne.s32.totalorder %s3614_s4, %s2351_s20  ;;  %p2358_p5 = scmp.lt.u32.totalorder %s2351_s20, %s3614_s4 }
  0x67   : > { %p2354_p10 = pnand %p2352_p6, %p2825_p13 }
  0x69   : > { %p2355_p3 = pneg %p2354_p10 }
  0x6b   : > { %p2360_p7 = pnand %p2358_p5, %p2355_p3 }
  0x6d   : > { %2363 = shalt.err (!%p2360_p7)
}
  0x6e   : > { %s2364_s2 = scalar_lea.vmem %s509_s19, 256  ;;  %p2372_p1 = scmp.lt.s32.totalorder %s509_s19, %s509_s19 }
  0x6f   : > { %p2365_p9 = scmp.ne.s32.totalorder %s509_s19, %s2364_s2  ;;  %p2373_p2 = scmp.lt.s32.totalorder %s2364_s2, %s2364_s2 }
  0x71   : > { %p2367_p12 = pnand %p2365_p9, %p2825_p13  ;;  %p2374_p4 = por %p2373_p2, %p2372_p1 }
  0x73   : > { %p2368_p0 = pneg %p2367_p12 }
  0x75   : > { %p2375_p8 = pnand %p2374_p4, %p2368_p0 }
  0x77   : > { %2378 = shalt.err (!%p2375_p8)
}
  0x78   : > { %s2638_s25 = smov 64   ;;  %s2639_s3 = smov 4  }
  0x79   : > { %2204 = dma.hbm_to_vmem [thread:$0]  (!%p2809_p11), %s3614_s4, 256, %s509_s19, [#allocation6], %s2638_s25, %s2638_s25, %s2639_s3  }
  0x7a   : > { %s2640_s27 = smov [#allocation10]   ;;  %s2379_s26 = scalar_lea.hbm %s3554_s9, 32 }
  0x7b   : > { %s544_s20 = sshll.u32 %s2640_s27, 4  ;;  %p2380_p4 = scmp.ne.s32.totalorder %s3554_s9, %s2379_s26  ;;  %s545_s20 = int_to_ptr.vmem [resolvable:$true] %s544_s20 }
  0x7c   : > { %p2386_p10 = scmp.lt.u32.totalorder %s2379_s26, %s3554_s9 }
  0x7d   : > { %p2382_p8 = pnand %p2380_p4, %p2825_p13 }
  0x7f   : > { %p2383_p6 = pneg %p2382_p8 }
  0x81   : > { %p2388_p3 = pnand %p2386_p10, %p2383_p6 }
  0x83   : > { %2391 = shalt.err (!%p2388_p3)
}
  0x84   : > { %s2392_s19 = scalar_lea.vmem %s545_s20, 32  ;;  %p2400_p12 = scmp.lt.s32.totalorder %s545_s20, %s545_s20 }
  0x85   : > { %p2393_p5 = scmp.ne.s32.totalorder %s545_s20, %s2392_s19  ;;  %p2401_p0 = scmp.lt.s32.totalorder %s2392_s19, %s2392_s19 }
  0x87   : > { %p2395_p7 = pnand %p2393_p5, %p2825_p13  ;;  %p2402_p1 = por %p2401_p0, %p2400_p12 }
  0x89   : > { %p2396_p9 = pneg %p2395_p7 }
  0x8b   : > { %p2403_p2 = pnand %p2402_p1, %p2396_p9 }
  0x8d   : > { %2406 = shalt.err (!%p2403_p2)
}
  0x8e   : > { %2210 = dma.hbm_to_vmem [thread:$0]  (!%p2809_p11), %s3554_s9, 32, %s545_s20, [#allocation9]  }
  0x8f   : > { %s2913_s17 = sadd.s32 1, %s2631_s30   ;;  %s50_s14 = sadd.s32 1, %s2627_s29 }
  0x90   : > { %s47_s23 = ssub.s32 %s2631_s30, %s2913_s17  ;;  %p57_p13 = scmp.ne.s32.totalorder %s2627_s29, %s2623_s28 }
  0x91   : > { %p48_p4 = scmp.eq.s32.totalorder %s47_s23, 0  ;;  %p58_p8 = scmp.eq.s32.totalorder %s2631_s30, 0 }
  0x92   : > { %p3615_p6 = scmp.eq.s32.totalorder %s2777_s0, 1  ;;  %p2235_p3 = scmp.lt.s32.totalorder %s2631_s30, 2 }
  0x93   : > { %s2929_s13 = scalar_select %p48_p4, %s2627_s29, %s50_s14  }
  0x94   : > { %p2923_p10 = por %p3615_p6, %p57_p13  ;;  %p59_p5 = por %p58_p8, %p57_p13 }
  0x95   : > { %s567_s15 = sand.u32 1, %s2627_s29   ;;  %s2168_s20 = smul.u32 1536, %s2631_s30 }
  0x96   : > { %s2167_s27 = smul.u32 96, %s567_s15  ;;  %p2933_p11 = pnand %p2235_p3, %p59_p5 }
  0x97   : > { %s3618_s5 = sld [smem:[#allocation26_spill]]  ;;  %s2944_s3 = scalar_lea.sflag [#allocation3], %s567_s15 }
  0x98   : > { %s571_s19 = scalar_lea.vmem [#allocation2], %s2167_s27  ;;  %p2409_p9 = pneg %p2933_p11 }
  0x99   : > { %s578_s25 = sshll.u32 %s571_s19, 4  ;;  %s2942_s25 = int_to_ptr.vmem [resolvable:$true] %s578_s25 }
  0x9d   : > { %s2940_s2 = scalar_lea.hbm %s3618_s5, %s2168_s20  ;;  %s2412_s24 = scalar_lea.hbm %s3618_s5, 3072 }
  0x9e   : > { %s2407_s14 = scalar_lea.hbm %s2940_s2, 1536  ;;  %p2413_p1 = scmp.lt.u32.totalorder %s2940_s2, %s3618_s5 }
  0x9f   : > { %p2408_p7 = scmp.ne.s32.totalorder %s2940_s2, %s2407_s14  ;;  %p2414_p2 = scmp.lt.u32.totalorder %s2412_s24, %s2407_s14 }
  0xa0   : > { %p2416_p4 = scmp.lt.u32.totalorder %s2407_s14, %s2940_s2 }
  0xa1   : > { %p2410_p12 = pnand %p2409_p9, %p2408_p7  ;;  %p2415_p13 = por %p2414_p2, %p2413_p1 }
  0xa3   : > { %p2411_p0 = pneg %p2410_p12  ;;  %p2417_p8 = por %p2416_p4, %p2415_p13 }
  0xa5   : > { %p2418_p6 = pnand %p2417_p8, %p2411_p0 }
  0xa7   : > { %2421 = shalt.err (!%p2418_p6)
}
  0xa8   : > { %s2422_s15 = scalar_lea.vmem %s2942_s25, 1536  ;;  %s2641_s27 = smov [#allocation2]  }
  0xa9   : > { %p2423_p3 = scmp.ne.s32.totalorder %s2942_s25, %s2422_s15  ;;  %s2427_s19 = sshll.u32 %s2641_s27, 4  ;;  %s2428_s19 = int_to_ptr.vmem [resolvable:$false] %s2427_s19 }
  0xaa   : > { %s2429_s4 = scalar_lea.vmem %s2428_s19, 3072  ;;  %p2430_p12 = scmp.lt.s32.totalorder %s2942_s25, %s2428_s19 }
  0xab   : > { %p2425_p5 = pnand %p2423_p3, %p2409_p9  ;;  %p2431_p1 = scmp.lt.s32.totalorder %s2429_s4, %s2422_s15 }
  0xad   : > { %p2426_p7 = pneg %p2425_p5  ;;  %p2432_p2 = por %p2431_p1, %p2430_p12 }
  0xaf   : > { %p2433_p13 = pnand %p2432_p2, %p2426_p7 }
  0xb1   : > { %2436 = shalt.err (!%p2433_p13)
}
  0xb2   : > { %s3619_s14 = smov 8   ;;  %s3620_s23 = smov 128  }
  0xb3   : > { %2214 = dma.hbm_to_vmem [thread:$0]  (!%p2933_p11), %s2940_s2, 1536, %s2942_s25, %s2944_s3, %s3620_s23, %s3620_s23, %s3619_s14  }
  0xb4   : > { %p3621_p9 = scmp.ne.s32.totalorder %s3608_s21, 0 }
  0xb5   : > { %s2978_s20 = sand.u32 (!%p3621_p9), 1, %s2623_s28   ;;  %p3622_p0 = scmp.ne.s32.totalorder (!%p3621_p9), %s3605_s1, 0 }
  0xb6   : > { %590 = sbr.rel (%p3621_p9) target bundleno = 2314 (0x90a), region = 76  ;;  %s593_s26 = scalar_lea.sflag (!%p3621_p9), [#allocation3], %s2978_s20 }
  0xb7   : > { %s2169_s24 = smul.u32 (!%p3621_p9), 96, %s2978_s20 }
  0xb9   : > { %s2982_s15 = scalar_lea.vmem (!%p3621_p9), [#allocation2], %s2169_s24 }
  0xbd   : > { %2594 = dma.done.wait (%p3622_p0), %s593_s26, 1536  }
  0xbe   : > { %2596 = vsyncadd (%p3622_p0), %s593_s26, 4294965760  ;;  %p3623_p11 = scmp.eq.s32.totalorder %s2777_s0, 0 }
  0xc0   : > { %2598 = dma.done.wait (%p3623_p11), [#allocation6], 2304   ;;  %p3624_p4 = pmov %p3623_p11 }
  0xc2   : > { %2600 = vsyncadd (%p3624_p4), [#allocation6], 4294964992  ;;  %p3625_p8 = pmov %p3624_p4 }
  0xc3   : > { %p3626_p6 = pmov %p3624_p4 }
  0xc4   : > { %2602 = dma.done.wait (%p3625_p8), [#allocation9], 288  }
  0xc5   : > { %2604 = vsyncadd (%p3626_p6), [#allocation9], 4294967008  ;;  %v840_v0 = vld [vmem:[%s3555_s10] sm:$0xff]  ;;  %v841_v1 = vld [vmem:[%s3555_s10 + $0x8] sm:$0xff]  ;;  %vm835_vm0 = vcmask 261120   ;;  %s2642_s4 = smov 32   ;;  %v715_v37 = vlaneseq }
  0xc6   : > { %v842_v2 = vld [vmem:[%s3555_s10 + $0x10] sm:$0xff]  ;;  %v2144_v3 = vpack.c.bf16 %v841_v1, %v840_v0  ;;  %v843_v4 = vld [vmem:[%s3555_s10 + $0x18] sm:$0xff]  ;;  %v685_v5 = vld [vmem:[%s2982_s15] sm:$0xff]  ;;  %vm1088_vm1 = vcmask 130048   ;;  %s3627_s1 = sld [smem:[#allocation28_spill]]  ;;  %v2644_v63 = vmov 0.0|0.0  }
  0xc7   : > { %v2005_v6 = vld [vmem:[%s2982_s15 + $0x20] sm:$0xff]  ;;  %v2148_v7 = vpack.c.bf16 %v843_v4, %v842_v2  ;;  %v686_v10 = vld [vmem:[%s2982_s15 + $0x8] sm:$0xff]  ;;  %v687_v13 = vld [vmem:[%s2982_s15 + $0x10] sm:$0xff]  ;;  %v3052_v38 = vshrl.u32 %v715_v37, 7  ;;  %vm2645_vm4 = vmmov 0   ;;  %v2646_v0 = vmov 0.0  }
  0xc8   : > { %v694_v8 = vadd.f32 %v2005_v6, %v685_v5  ;;  %v2009_v9 = vld [vmem:[%s2982_s15 + $0x40] sm:$0xff]  ;;  %v2006_v11 = vld [vmem:[%s2982_s15 + $0x28] sm:$0xff]  ;;  %2145 = vmatprep.subr.bf16.mxu0 %v2144_v3  ;;  %v2007_v14 = vld [vmem:[%s2982_s15 + $0x30] sm:$0xff]  ;;  %vm1044_vm5 = vcmask 1047680   ;;  %s3628_s7 = sld [smem:[#allocation33_spill]]  ;;  %vm1280_vm6 = vcmask 64512  }
  0xc9   : > { %v695_v12 = vadd.f32 %v2006_v11, %v686_v10  ;;  %2147 = vmatpush3.bf16.msra.mxu0 %v2144_v3  ;;  %v2010_v16 = vld [vmem:[%s2982_s15 + $0x48] sm:$0xff]  ;;  %v696_v17 = vadd.f32 %v2007_v14, %v687_v13  ;;  %v688_v18 = vld [vmem:[%s2982_s15 + $0x18] sm:$0xff]  ;;  %v2011_v20 = vld [vmem:[%s2982_s15 + $0x50] sm:$0xff]  ;;  %vm717_vm2 = vcmp.lt.s32.totalorder %v3052_v38, 1  ;;  %vm735_vm3 = vcmp.lt.s32.totalorder %v3052_v38, 7  ;;  %s3629_s27 = sld [smem:[#allocation34_spill]] }
  0xca   : > { %v3015_v15 = vadd.f32 %v2009_v9, %v694_v8  ;;  %v2008_v19 = vld [vmem:[%s2982_s15 + $0x38] sm:$0xff]  ;;  %2149 = vmatprep.subr.bf16.mxu0 %v2148_v7  ;;  %v941_v26 = vld [vmem:[#allocation8] sm:$0xff]  ;;  %v1091_v30 = vld [vmem:[%s3556_s11] sm:$0xff]  ;;  %vm1477_vm7 = vcmask 1043456   ;;  %vm1473_vm8 = vcmask 31744   ;;  %s2647_s19 = smov 4  }
  0xcb   : > { %v3023_v21 = vadd.f32 %v2010_v16, %v695_v12  ;;  %v697_v22 = vadd.f32 %v2008_v19, %v688_v18  ;;  %v3025_v23 = vadd.f32 %v2011_v20, %v696_v17  ;;  %v2012_v24 = vld [vmem:[%s2982_s15 + $0x58] sm:$0xff]  ;;  %2107 = vmatprep.mubr.msk.f32.mxu1 %vm835_vm0, %v941_v26  ;;  %v1092_v31 = vld [vmem:[%s3556_s11 + $0x8] sm:$0xff]  ;;  %s2643_s15 = smov 16   ;;  %v1282_v9 = vld [vmem:[%s3557_s12] sm:$0xff]  ;;  %s3582_s14 = smov 8   ;;  %vm1447_vm9 = vcmask 1047584  }
  0xcc   : > { %2093 = vmatprep.mubr.msk.f32.mxu0 %vm835_vm0, %v3015_v15  ;;  %750 = vrot.lane.b32.xlu1 %v3015_v15, %s2642_s4  ;;  %v2160_v35 = vpack.c.bf16 %v1092_v31, %v1091_v30  ;;  %v942_v36 = vld [vmem:[#allocation8 + $0x8] sm:$0xff]  ;;  %v1024_v43 = vld [vmem:[%s3627_s1] sm:$0xff]  ;;  %v1025_v46 = vld [vmem:[%s3627_s1 + $0x8] sm:$0xff]  ;;  %vm749_vm10 = vcmask 1047808   ;;  %s2649_s23 = smov 2   ;;  %vm1257_vm11 = vcmask 1047616  }
  0xcd   : > { %2151 = vmatpush3.bf16.msra.mxu0 %v2148_v7  ;;  %v3030_v25 = vadd.f32 %v2012_v24, %v697_v22  ;;  %753 = vrot.lane.b32.xlu0 %v3023_v21, %s2642_s4  ;;  %v2019_v47 = vld [vmem:[%s3627_s1 + $0x10] sm:$0xff]  ;;  %v2020_v50 = vld [vmem:[%s3627_s1 + $0x18] sm:$0xff]  ;;  %v1356_v12 = vld [vmem:[%s3553_s8] sm:$0xf]  ;;  %s2651_s24 = smov 125   ;;  %vm1643_vm12 = vcmask 1047568  }
  0xce   : > { %2164 = vmatprep.subr.bf16.mxu0 %v2644_v63  ;;  %v1174_v8 = vld [vmem:[%s3628_s7] sm:$0xff]  ;;  %s2653_s26 = smov 127   ;;  %s2654_s21 = smov 121   ;;  %v711_v63 = vrot.slane %v3015_v15, 7  ;;  %vm1431_vm13 = vcmask 1047556  }
  0xcf   : > { %v1472_v16 = vld [vmem:[%s3629_s27] sm:$0xf]  ;;  %s2001_s27 = sshll.u32 %s2978_s20, 4  ;;  %s3631_s3 = sld [smem:[#allocation36_spill]] }
  0xd0   : > { %2094 = vmatmul.mubr.msk.f32.vlgmr.msra.gmra.mrb[0].mxu0 %vm835_vm0, %v3023_v21  ;;  %756 = vrot.lane.b32.xlu1 %v3025_v23, %s2642_s4  ;;  %s3632_s2 = sand.u32 1, %s2777_s0  }
  0xd1   : > { %2096 = vmatprep.mubr.msk.f32.mxu0 %vm835_vm0, %v3025_v23  ;;  %759 = vrot.lane.b32.xlu0 %v3030_v25, %s2642_s4 }
  0xd4   : > { %2097 = vmatmul.mubr.msk.f32.gmra.mrb[2].mxu0 %vm835_vm0, %v3030_v25 }
  0xd5   : > { %2121 = vmatprep.mubr.msk.f32.mxu0 %vm2645_vm4, %v2646_v0 }
 0x13e   : > { %v751_v22 = vpop.permute.xlu1 %750 }
 0x13f   : > { %v754_v1 = vpop.permute.xlu0 %753 }
 0x142   : > { %v757_v24 = vpop.permute.xlu1 %756 }
 0x143   : > { %v760_v2 = vpop.permute.xlu0 %759  ;;  %v758_v37 = vsel %vm749_vm10, %v757_v24, %v3025_v23 }
 0x1a3   : > { %v2095_v27 = vpop.f32.mrb[0].mxu0 }
 0x1a4   : > { %v922_v28 = vpop.f32.mrb[1].mxu0 }
 0x1a5   : > { %v2152_v29 = vpack.c.bf16 %v2095_v27, %v922_v28  ;;  %v755_v28 = vsel %vm749_vm10, %v754_v1, %v3023_v21 }
 0x1a7   : > { %v2098_v32 = vpop.f32.mrb[2].mxu0  ;;  %2153 = vmatprep.subr.bf16.mxu1 %v2152_v29 }
 0x1a8   : > { %v932_v33 = vpop.f32.mrb[3].mxu0  ;;  %2155 = vmatpush3.bf16.msra.mxu1 %v2152_v29  ;;  %v1551_v29 = vld [vmem:[#allocation10] sm:$0x3] }
 0x1a9   : > { %v2156_v34 = vpack.c.bf16 %v2098_v32, %v932_v33  ;;  %v761_v32 = vsel %vm749_vm10, %v760_v2, %v3030_v25  ;;  %v707_v2 = vld [vmem:[#allocation5] sm:$0xff] }
 0x1ab   : > { %2157 = vmatprep.subr.bf16.mxu1 %v2156_v34 }
 0x1ac   : > { %2159 = vmatpush3.bf16.msra.mxu1 %v2156_v34 }
 0x1ad   : > { %2161 = vmatprep.subr.bf16.mxu1 %v2160_v35 }
 0x1af   : > { %2108 = vmatmul.mubr.msk.f32.vlgmr.msra.gmra.mrb[0].mxu1 %vm835_vm0, %v942_v36 }
 0x1b0   : > { %2163 = vmatpush3.bf16.msra.mxu1 %v2160_v35  ;;  %v752_v35 = vsel %vm749_vm10, %v751_v22, %v3015_v15  ;;  %v734_v22 = vrot.slane %v3030_v25, 1 }
 0x1b1   : > { %2124 = vmatprep.subr.mxu1 %v2646_v0 }
 0x282   : > { %v3054_v39 = vpop.f32.mrb[0].mxu1 }
 0x283   : > { %1048 = vrot.lane.b32.xlu0 %v3054_v39, %s2643_s15  ;;  %v3058_v40 = vpop.f32.mrb[1].mxu1  ;;  %v1027_v41 = vrot.slane %v3054_v39, 7  ;;  %v1036_v42 = vrot.slane %v3054_v39, 1  ;;  %v1079_v55 = vmul.f32 4.0, %v3054_v39 }
 0x284   : > { %2114 = vmatprep.mubr.msk.f32.mxu1 %vm1088_vm1, %v3058_v40  ;;  %v1026_v44 = vrot.slane %v3058_v40, 7  ;;  %v1035_v45 = vrot.slane %v3058_v40, 1  ;;  %v1078_v54 = vmul.f32 4.0, %v3058_v40 }
 0x285   : > { %2115 = vmatmul.mubr.msk.f32.vlgmr.msra.gmra.mrb[2].mxu1 %vm1088_vm1, %v3054_v39 }
 0x286   : > { %v1029_v48 = vsel %vm717_vm2, %v1027_v41, %v1026_v44  ;;  %v1037_v49 = vsel %vm735_vm3, %v1035_v45, %v1036_v42  ;;  %v1028_v51 = vsel %vm717_vm2, %v1026_v44, %v1027_v41  ;;  %v1038_v52 = vsel %vm735_vm3, %v1036_v42, %v1035_v45  ;;  %2126 = vmatprep.mubr.msk.f32.mxu1 %vm2645_vm4, %v2646_v0 }
 0x287   : > { %1045 = vrot.lane.b32.xlu0 %v3058_v40, %s2643_s15  ;;  %v1030_v53 = vmul.f32 %v1029_v48, %v1024_v43  ;;  %v1031_v56 = vmul.f32 %v1028_v51, %v1025_v46  ;;  %v1039_v57 = vmul.f32 %v2019_v47, %v1037_v49  ;;  %v1040_v59 = vmul.f32 %v2020_v50, %v1038_v52 }
 0x288   : > { %2125 = vmatpush3.msra.mxu1 %v1282_v9 }
 0x289   : > { %v1080_v58 = vsub.f32 %v1078_v54, %v1030_v53  ;;  %v1081_v60 = vsub.f32 %v1079_v55, %v1031_v56  ;;  %2134 = vmatprep.subr.mxu1 %v2646_v0 }
 0x28b   : > { %v3094_v61 = vsub.f32 %v1080_v58, %v1039_v57  ;;  %v3096_v62 = vsub.f32 %v1081_v60, %v1040_v59 }
 0x2f5   : > { %v1049_v3 = vpop.permute.xlu0 %1048 }
 0x2f6   : > { %v1050_v4 = vsel %vm1044_vm5, %v1049_v3, %v3054_v39 }
 0x2f9   : > { %v1046_v19 = vpop.permute.xlu0 %1045 }
 0x2fa   : > { %v1047_v20 = vsel %vm1044_vm5, %v1046_v19, %v3058_v40 }
 0x358   : > { %v2116_v5 = vpop.f32.mrb[2].mxu1 }
 0x359   : > { %v1165_v6 = vpop.f32.mrb[3].mxu1 }
 0x35a   : > { %v2165_v7 = vpack.c.bf16 %v2116_v5, %v1165_v6  ;;  %v731_v5 = vrot.slane %v3015_v15, 1  ;;  %v712_v6 = vrot.slane %v3023_v21, 7 }
 0x35c   : > { %2166 = vmatpush3.bf16.msra.mxu0 %v2165_v7  ;;  %v713_v7 = vrot.slane %v3025_v23, 7 }
 0x35d   : > { %2129 = vmatprep.subr.mxu0 %v2646_v0 }
 0x35e   : > { %v719_v19 = vsel %vm717_vm2, %v712_v6, %v713_v7 }
 0x35f   : > { %2122 = vmatmul.mubr.msk.f32.vlgmr.msra.gmra.mrb[4].mxu0 %vm1088_vm1, %v1174_v8 }
 0x360   : > { %2131 = vmatprep.mubr.msk.f32.mxu0 %vm2645_vm4, %v2646_v0 }
 0x432   : > { %v3110_v10 = vpop.f32.mrb[4].mxu0 }
 0x433   : > { %2127 = vmatmul.mubr.msk.f32.vlgmr.msra.gmra.mrb[4].mxu1 %vm1280_vm6, %v3110_v10  ;;  %v2123_v11 = vpop.f32.mrb[5].mxu0 }
 0x434   : > { %2136 = vmatprep.mubr.msk.f32.mxu1 %vm2645_vm4, %v2646_v0  ;;  %2135 = vmatpush3.msk.msra.mxu1 %vm1477_vm7, %v1472_v16  ;;  %v727_v11 = vld [vmem:[#allocation5 + $0x20] sm:$0xff] }
 0x506   : > { %v1352_v13 = vpop.f32.mrb[4].mxu1 }
 0x507   : > { %2130 = vmatpush3.msra.mxu0 %v1352_v13  ;;  %v2128_v14 = vpop.f32.mrb[5].mxu1 }
 0x508   : > { %2132 = vmatmul.mubr.msk.f32.vlgmr.msra.gmra.mrb[6].mxu0 %vm1280_vm6, %v1356_v12  ;;  %2139 = vmatprep.subr.mxu0 %v2646_v0  ;;  %v815_v14 = vmul.f32 4.0, %v3015_v15 }
 0x509   : > { %2141 = vmatprep.mubr.msk.f32.mxu0 %vm2645_vm4, %v2646_v0  ;;  %v714_v0 = vrot.slane %v3030_v25, 7 }
 0x50b   : > { %v721_v3 = vsel %vm717_vm2, %v714_v0, %v711_v63 }
 0x50c   : > { %v722_v12 = vmul.f32 %v721_v3, %v707_v2  ;;  %v797_v2 = vld [vmem:[#allocation5 + $0x70] sm:$0xff]  ;;  %v1430_v3 = vld [vmem:[#allocation7] sm:$0xf] }
 0x5db   : > { %v3124_v17 = vpop.f32.mrb[6].mxu0 }
 0x5dc   : > { %1448 = vrot.lane.b32.xlu1 %v3124_v17, %s2647_s19  ;;  %2137 = vmatmul.mubr.msk.f32.vlgmr.msra.gmra.mrb[6].mxu1 %vm1473_vm8, %v3124_v17  ;;  %v2133_v18 = vpop.f32.mrb[7].mxu0  ;;  %v1432_v1 = vrot.slane %v3124_v17, 4 }
 0x5dd   : > { %v709_v18 = vld [vmem:[#allocation5 + $0x10] sm:$0xff] }
 0x5de   : > { %v1433_v9 = vsel %vm1431_vm13, %v1432_v1, %v3124_v17  ;;  %v1253_v1 = vrot.slane %v3110_v10, 1 }
 0x5e0   : > { %1258 = vrot.lane.b32.xlu1 %v3110_v10, %s3582_s14 }
 0x5e4   : > { %1051 = vrot.lane.b32.xlu1 %v1047_v20, %s2643_s15  ;;  %v733_v20 = vrot.slane %v3025_v23, 1 }
 0x64e   : > { %v1449_v26 = vpop.permute.xlu1 %1448 }
 0x64f   : > { %v1450_v27 = vsel %vm1447_vm9, %v1449_v26, %v3124_v17  ;;  %v1434_v26 = vrot.slane %v1433_v9, 4  ;;  %v708_v9 = vld [vmem:[#allocation5 + $0x8] sm:$0xff] }
 0x650   : > { %1451 = vrot.lane.b32.xlu1 %v1450_v27, %s2647_s19  ;;  %v2022_v27 = vld [vmem:[%s3627_s1 + $0x28] sm:$0xff] }
 0x652   : > { %v1259_v36 = vpop.permute.xlu1 %1258 }
 0x653   : > { %v1260_v42 = vsel %vm1257_vm11, %v1259_v36, %v3110_v10  ;;  %v2024_v36 = vld [vmem:[%s3627_s1 + $0x38] sm:$0xff] }
 0x654   : > { %764 = vrot.lane.b32.xlu1 %v755_v28, %s2642_s4 }
 0x656   : > { %v1052_v41 = vpop.permute.xlu1 %1051 }
 0x657   : > { %v1055_v44 = vsel %vm1044_vm5, %v1052_v41, %v3058_v40 }
 0x658   : > { %768 = vrot.lane.b32.xlu1 %v761_v32, %s2642_s4  ;;  %v736_v32 = vsel %vm735_vm3, %v733_v20, %v734_v22 }
 0x6af   : > { %v1547_v30 = vpop.f32.mrb[6].mxu1 }
 0x6b0   : > { %2140 = vmatpush3.msk.msra.mxu0 %vm1477_vm7, %v1547_v30  ;;  %v2138_v31 = vpop.f32.mrb[7].mxu1  ;;  %v724_v30 = vmul.f32 %v719_v19, %v709_v18 }
 0x6b1   : > { %2142 = vmatmul.mubr.msk.f32.vlgmr.msra.gmra.mrb[8].mxu0 %vm1473_vm8, %v1551_v29  ;;  %v819_v29 = vsub.f32 %v815_v14, %v722_v12  ;;  %v729_v31 = vld [vmem:[#allocation5 + $0x30] sm:$0xff] }
 0x6c2   : > { %v1452_v43 = vpop.permute.xlu1 %1451 }
 0x6c3   : > { %v1453_v46 = vsel %vm1447_vm9, %v1452_v43, %v3124_v17  ;;  %v3234_v43 = vsel %vm1431_vm13, %v1434_v26, %v3124_v17 }
 0x6c6   : > { %v765_v45 = vpop.permute.xlu1 %764 }
 0x6c7   : > { %v771_v47 = vsel %vm749_vm10, %v765_v45, %v3023_v21  ;;  %v742_v45 = vmul.f32 %v736_v32, %v729_v31 }
 0x6ca   : > { %v769_v48 = vpop.permute.xlu1 %768 }
 0x6cb   : > { %v773_v49 = vsel %vm749_vm10, %v769_v48, %v3030_v25 }
 0x784   : > { %v3144_v33 = vpop.f32.mrb[8].mxu0 }
 0x785   : > { %1644 = vrot.lane.b32.xlu0 %v3144_v33, %s2649_s23  ;;  %v2143_v34 = vpop.f32.mrb[9].mxu0 }
 0x786   : > { %v817_v34 = vmul.f32 4.0, %v3025_v23 }
 0x789   : > { %1053 = vrot.lane.b32.xlu0 %v1050_v4, %s2643_s15  ;;  %s2650_s15 = smov 113   ;;  %v732_v4 = vrot.slane %v3023_v21, 1 }
 0x78b   : > { %v738_v13 = vsel %vm735_vm3, %v731_v5, %v732_v4  ;;  %v737_v31 = vsel %vm735_vm3, %v732_v4, %v733_v20 }
 0x78c   : > { %v740_v28 = vmul.f32 %v738_v13, %v727_v11  ;;  %v1275_v13 = vmul.f32 4.0, %v3110_v10 }
 0x78d   : > { %762 = vrot.lane.b32.xlu0 %v752_v35, %s2642_s4 }
 0x791   : > { %766 = vrot.lane.b32.xlu0 %v758_v37, %s2642_s4  ;;  %s2652_s4 = smov 97  }
 0x795   : > { %1261 = vrot.lane.b32.xlu0 %v1260_v42, %s3582_s14  ;;  %v1249_v42 = vrot.slane %v3110_v10, 7 }
 0x799   : > { %1059 = vrot.lane.b32.xlu0 %v1055_v44, %s2650_s15 }
 0x79d   : > { %1455 = vrot.lane.b32.xlu0 %v1453_v46, %s2651_s24  ;;  %s3245_s24 = scalar_lea.vmem [#allocation12], %s2001_s27 }
 0x79e   : > { %s1715_s22 = sshll.u32 %s3245_s24, 4  ;;  %s3318_s22 = int_to_ptr.vmem [resolvable:$true] %s1715_s22 }
 0x79f   : > { %s2437_s25 = scalar_lea.vmem %s3318_s22, 256 }
 0x7a0   : > { %p2438_p3 = scmp.ne.s32.totalorder %s3318_s22, %s2437_s25 }
 0x7a1   : > { %780 = vrot.lane.b32.xlu0 %v771_v47, %s2652_s4 }
 0x7a2   : > { %p2439_p5 = pnand %p2438_p3, %p2923_p10 }
 0x7a4   : > { %p2440_p7 = pneg %p2439_p5 }
 0x7a5   : > { %784 = vrot.lane.b32.xlu0 %v773_v49, %s2652_s4 }
 0x7f7   : > { %v1645_v40 = vpop.permute.xlu0 %1644 }
 0x7f8   : > { %v1646_v50 = vsel %vm1643_vm12, %v1645_v40, %v3144_v33  ;;  %v823_v40 = vsub.f32 %v819_v29, %v740_v28  ;;  %v816_v28 = vmul.f32 4.0, %v3023_v21  ;;  %v718_v21 = vsel %vm717_vm2, %v713_v7, %v714_v0  ;;  %v2023_v0 = vld [vmem:[%s3627_s1 + $0x30] sm:$0xff] }
 0x7f9   : > { %1647 = vrot.lane.b32.xlu1 %v1646_v50, %s2649_s23  ;;  %v821_v50 = vsub.f32 %v817_v34, %v724_v30  ;;  %v728_v30 = vld [vmem:[#allocation5 + $0x28] sm:$0xff] }
 0x7fb   : > { %v1054_v51 = vpop.permute.xlu0 %1053  ;;  %v825_v12 = vsub.f32 %v821_v50, %v742_v45  ;;  %v739_v50 = vsel %vm735_vm3, %v734_v22, %v731_v5 }
 0x7fc   : > { %v1056_v52 = vsel %vm1044_vm5, %v1054_v51, %v3054_v39 }
 0x7fd   : > { %1072 = vrot.lane.b32.xlu0 %v1056_v52, %s2653_s26  ;;  %1061 = vrot.lane.b32.xlu1 %v1056_v52, %s2650_s15  ;;  %s3630_s15 = sld [smem:[#allocation29_spill]] }
 0x7ff   : > { %v763_v53 = vpop.permute.xlu0 %762 }
 0x800   : > { %v770_v54 = vsel %vm749_vm10, %v763_v53, %v3015_v15 }
 0x801   : > { %778 = vrot.lane.b32.xlu1 %v770_v54, %s2652_s4  ;;  %799 = vrot.lane.b32.xlu0 %v770_v54, %s2653_s26 }
 0x803   : > { %v767_v55 = vpop.permute.xlu0 %766 }
 0x804   : > { %v772_v56 = vsel %vm749_vm10, %v767_v55, %v3025_v23 }
 0x805   : > { %782 = vrot.lane.b32.xlu1 %v772_v56, %s2652_s4  ;;  %803 = vrot.lane.b32.xlu0 %v772_v56, %s2653_s26  ;;  %s2000_s4 = sshll.u32 %s2978_s20, 5 }
 0x806   : > { %s3265_s27 = scalar_lea.vmem [#allocation11], %s2000_s4  ;;  %s2003_s4 = sshll.u32 %s2978_s20, 2 }
 0x807   : > { %v1262_v57 = vpop.permute.xlu0 %1261  ;;  %s3321_s14 = scalar_lea.vmem [#allocation15], %s2003_s4 }
 0x808   : > { %v1263_v39 = vsel %vm1257_vm11, %v1262_v57, %v3110_v10  ;;  %v1437_v57 = vrot.slane %v3234_v43, 3  ;;  %v2029_v10 = vld [vmem:[%s3630_s15 + $0x10] sm:$0xff] }
 0x809   : > { %1265 = vrot.lane.b32.xlu1 %v1263_v39, %s2654_s21  ;;  %s2055_s21 = sshll.u32 %s2777_s0, 8 }
 0x80a   : > { %s3316_s19 = scalar_lea.hbm %s3631_s3, %s2055_s21  ;;  %s3328_s21 = scalar_lea.sflag [#allocation13], %s3632_s2 }
 0x80b   : > { %v3182_v58 = vpop.permute.xlu0 %1059 }
 0x80d   : > { %1070 = vrot.lane.b32.xlu1 %v1055_v44, %s2653_s26  ;;  %v745_v44 = vld [vmem:[#allocation5 + $0x40] sm:$0xff] }
 0x80f   : > { %v3184_v59 = vpop.permute.xlu0 %1455 }
 0x811   : > { %1461 = vrot.lane.b32.xlu1 %v1453_v46, %s2653_s26  ;;  %v1248_v46 = vld [vmem:[%s3630_s15] sm:$0xff] }
 0x812   : > { %v1250_v55 = vmul.f32 %v1249_v42, %v1248_v46  ;;  %v741_v46 = vmul.f32 %v737_v31, %v728_v30 }
 0x813   : > { %v3186_v60 = vpop.permute.xlu0 %780 }
 0x815   : > { %801 = vrot.lane.b32.xlu1 %v771_v47, %s2653_s26  ;;  %v795_v47 = vld [vmem:[#allocation5 + $0x60] sm:$0xff] }
 0x817   : > { %v3199_v8 = vpop.permute.xlu0 %784 }
 0x819   : > { %805 = vrot.lane.b32.xlu1 %v773_v49, %s2653_s26 }
 0x86b   : > { %v1648_v16 = vpop.permute.xlu1 %1647 }
 0x86c   : > { %v1649_v24 = vsel %vm1643_vm12, %v1648_v16, %v3144_v33  ;;  %v2028_v16 = vld [vmem:[%s3630_s15 + $0x8] sm:$0xff] }
 0x86d   : > { %1651 = vrot.lane.b32.xlu0 %v1649_v24, %s2653_s26  ;;  %v1276_v24 = vsub.f32 %v1275_v13, %v1250_v55  ;;  %v1254_v34 = vmul.f32 %v2028_v16, %v1253_v1 }
 0x86f   : > { %v1062_v35 = vpop.permute.xlu1 %1061  ;;  %v1073_v37 = vpop.permute.xlu0 %1072  ;;  %v3278_v42 = vsub.f32 %v1276_v24, %v1254_v34 }
 0x870   : > { %v1066_v41 = vmul.f32 %v2022_v27, %v1062_v35  ;;  %v1077_v49 = vmul.f32 %v2024_v36, %v1073_v37  ;;  %v1439_v27 = vmul.f32 %v1437_v57, %v1430_v3  ;;  %v1442_v35 = vrot.slane %v3234_v43, 1  ;;  %v710_v37 = vld [vmem:[#allocation5 + $0x18] sm:$0xff]  ;;  %v1460_v57 = vld [vmem:[#allocation7 + $0xc] sm:$0xf] }
 0x871   : > { %1271 = vrot.lane.b32.xlu0 %v1263_v39, %s2653_s26  ;;  %v747_v39 = vld [vmem:[#allocation5 + $0x50] sm:$0xff]  ;;  %v1465_v36 = vmul.f32 4.0, %v3124_v17  ;;  %v1446_v17 = vld [vmem:[#allocation7 + $0x8] sm:$0xf]  ;;  %v3286_v7 = vmul.f32 %v718_v21, %v710_v37 }
 0x872   : > { %v1085_v48 = vsub.f32 %v3096_v62, %v1066_v41  ;;  %v720_v62 = vsel %vm717_vm2, %v711_v63, %v712_v6  ;;  %v2021_v6 = vld [vmem:[%s3627_s1 + $0x20] sm:$0xff]  ;;  %s2655_s1 = smov [#allocation12]  }
 0x873   : > { %v779_v51 = vpop.permute.xlu1 %778  ;;  %v800_v52 = vpop.permute.xlu0 %799  ;;  %v723_v29 = vmul.f32 %v720_v62, %v708_v9  ;;  %v1065_v20 = vmul.f32 %v2021_v6, %v3182_v58  ;;  %v1441_v41 = vld [vmem:[#allocation7 + $0x4] sm:$0xf]  ;;  %v1466_v45 = vsub.f32 %v1465_v36, %v1439_v27  ;;  %v3289_v58 = vmul.f32 4.0, %v3030_v25  ;;  %s2441_s23 = sshll.u32 %s2655_s1, 4  ;;  %s2442_s23 = int_to_ptr.vmem [resolvable:$false] %s2441_s23 }
 0x874   : > { %v1087_v53 = vsub.f32 %v1085_v48, %v1077_v49  ;;  %v790_v54 = vmul.f32 %v779_v51, %v745_v44  ;;  %v811_v56 = vmul.f32 %v800_v52, %v795_v47  ;;  %v1444_v48 = vmul.f32 %v1442_v35, %v1441_v41  ;;  %v746_v49 = vld [vmem:[#allocation5 + $0x48] sm:$0xff]  ;;  %s2443_s4 = scalar_lea.vmem %s2442_s23, 512  ;;  %p2444_p12 = scmp.lt.s32.totalorder %s3318_s22, %s2442_s23 }
 0x875   : > { %v820_v23 = vsub.f32 %v816_v28, %v723_v29  ;;  %v1084_v52 = vsub.f32 %v3094_v61, %v1065_v20  ;;  %v3309_v15 = vmul.f32 %v3186_v60, %v746_v49  ;;  %v822_v25 = vsub.f32 %v3289_v58, %v3286_v7  ;;  %v748_v61 = vld [vmem:[#allocation5 + $0x58] sm:$0xff]  ;;  %p2445_p1 = scmp.lt.s32.totalorder %s2443_s4, %s2437_s25 }
 0x876   : > { %1090 = vst.msk [vmem:[%s3245_s24 + $0x8] sm:$0xff] %vm1088_vm1, %v1087_v53  ;;  %v827_v11 = vsub.f32 %v823_v40, %v790_v54  ;;  %v730_v40 = vld [vmem:[#allocation5 + $0x38] sm:$0xff]  ;;  %v1458_v53 = vmul.f32 %v3184_v59, %v1446_v17  ;;  %v1467_v55 = vsub.f32 %v1466_v45, %v1444_v48 }
 0x877   : > { %v783_v14 = vpop.permute.xlu1 %782  ;;  %v804_v18 = vpop.permute.xlu0 %803  ;;  %v743_v38 = vmul.f32 %v739_v50, %v730_v40  ;;  %p2446_p2 = por %p2445_p1, %p2444_p12 }
 0x878   : > { %v792_v19 = vmul.f32 %v783_v14, %v747_v39  ;;  %v831_v26 = vsub.f32 %v827_v11, %v811_v56  ;;  %v813_v63 = vmul.f32 %v804_v18, %v797_v2  ;;  %v3306_v56 = vsub.f32 %v820_v23, %v741_v46  ;;  %v796_v39 = vld [vmem:[#allocation5 + $0x68] sm:$0xff] }
 0x879   : > { %v1468_v60 = vsub.f32 %v1467_v55, %v1458_v53  ;;  %p2447_p13 = pnand %p2446_p2, %p2440_p7 }
 0x87a   : > { %v829_v32 = vsub.f32 %v825_v12, %v792_v19  ;;  %836 = vst.msk [vmem:[%s3265_s27] sm:$0xff] %vm835_vm0, %v831_v26 }
 0x87b   : > { %v1266_v4 = vpop.permute.xlu1 %1265 }
 0x87c   : > { %v3280_v44 = vmul.f32 %v2029_v10, %v1266_v4  ;;  %v833_v43 = vsub.f32 %v829_v32, %v813_v63 }
 0x87e   : > { %v1278_v47 = vsub.f32 %v3278_v42, %v3280_v44  ;;  %838 = vst.msk [vmem:[%s3265_s27 + $0x10] sm:$0xff] %vm835_vm0, %v833_v43 }
 0x87f   : > { %v1071_v51 = vpop.permute.xlu1 %1070 }
 0x880   : > { %v1076_v54 = vmul.f32 %v2023_v0, %v1071_v51 }
 0x882   : > { %v1086_v5 = vsub.f32 %v1084_v52, %v1076_v54 }
 0x883   : > { %v1462_v59 = vpop.permute.xlu1 %1461 }
 0x884   : > { %1089 = vst.msk [vmem:[%s3245_s24] sm:$0xff] %vm1088_vm1, %v1086_v5  ;;  %v1464_v22 = vmul.f32 %v1462_v59, %v1460_v57 }
 0x885   : > { %2450 = shalt.err (!%p2447_p13)
}
 0x886   : > { %s2451_s24 = scalar_lea.hbm %s3316_s19, 256  ;;  %s2455_s1 = scalar_lea.hbm %s3631_s3, 512 }
 0x887   : > { %p2452_p9 = scmp.ne.s32.totalorder %s3316_s19, %s2451_s24  ;;  %p2456_p4 = scmp.lt.u32.totalorder %s3316_s19, %s3631_s3 }
 0x888   : > { %p2457_p8 = scmp.lt.u32.totalorder %s2455_s1, %s2451_s24  ;;  %p2459_p3 = scmp.lt.u32.totalorder %s2451_s24, %s3316_s19 }
 0x889   : > { %p2453_p0 = pnand %p2452_p9, %p2923_p10 }
 0x88a   : > { %p2458_p6 = por %p2457_p8, %p2456_p4 }
 0x88b   : > { %p2454_p11 = pneg %p2453_p0 }
 0x88c   : > { %p2460_p5 = por %p2459_p3, %p2458_p6 }
 0x88e   : > { %p2461_p7 = pnand %p2460_p5, %p2454_p11 }
 0x890   : > { %2464 = shalt.err (!%p2461_p7)
}
 0x891   : > { %s3586_s25 = smov 128   ;;  %s3633_s4 = smov 8   ;;  %vm1470_vm14 = vcmask 27648   ;;  %v828_v1 = vsub.f32 %v3306_v56, %v3309_v15  ;;  %v793_v2 = vmul.f32 %v3199_v8, %v748_v61  ;;  %v826_v3 = vsub.f32 %v822_v25, %v743_v38  ;;  %v802_v62 = vpop.permute.xlu1 %801  ;;  %v798_v12 = vld [vmem:[#allocation5 + $0x78] sm:$0xff] }
 0x892   : > { %2189 = dma.vmem_to_hbm [thread:$0]  (%p2923_p10), %s3318_s22, 256, %s3316_s19, %s3328_s21, %s3586_s25, %s3586_s25, %s3633_s4   ;;  %v1469_v9 = vsub.f32 %v1468_v60, %v1464_v22  ;;  %v812_v11 = vmul.f32 %v802_v62, %v796_v39 }
 0x893   : > { %s3634_s5 = sshll.u32 %s2777_s0, 6  ;;  %s3635_s2 = sld [smem:[#allocation38_spill]] }
 0x894   : > { %s3636_s23 = sshll.u32 %s3321_s14, 4  ;;  %1471 = vst.msk [vmem:[%s3321_s14] sm:$0xf] %vm1470_vm14, %v1469_v9  ;;  %s3637_s22 = sand.u32 1, %s2777_s0   ;;  %s3367_s23 = int_to_ptr.vmem [resolvable:$true] %s3636_s23 }
 0x895   : > { %s3372_s19 = scalar_lea.sflag [#allocation16], %s3637_s22  ;;  %s2465_s25 = scalar_lea.vmem %s3367_s23, 64 }
 0x896   : > { %p2466_p12 = scmp.ne.s32.totalorder %s3367_s23, %s2465_s25 }
 0x898   : > { %p2467_p1 = pnand %p2466_p12, %p2923_p10 }
 0x899   : > { %s3363_s1 = scalar_lea.hbm %s3635_s2, %s3634_s5  ;;  %s2657_s5 = smov [#allocation15]  }
 0x89a   : > { %p2468_p2 = pneg %p2467_p1  ;;  %s2469_s26 = sshll.u32 %s2657_s5, 4  ;;  %s2470_s26 = int_to_ptr.vmem [resolvable:$false] %s2469_s26 }
 0x89b   : > { %s2471_s24 = scalar_lea.vmem %s2470_s26, 128  ;;  %p2472_p13 = scmp.lt.s32.totalorder %s3367_s23, %s2470_s26 }
 0x89c   : > { %p2473_p9 = scmp.lt.s32.totalorder %s2471_s24, %s2465_s25 }
 0x89e   : > { %p2474_p0 = por %p2473_p9, %p2472_p13 }
 0x8a0   : > { %p2475_p11 = pnand %p2474_p0, %p2468_p2 }
 0x8a2   : > { %2478 = shalt.err (!%p2475_p11)
}
 0x8a3   : > { %s2479_s14 = scalar_lea.hbm %s3363_s1, 64  ;;  %s2483_s5 = scalar_lea.hbm %s3635_s2, 128 }
 0x8a4   : > { %p2480_p4 = scmp.ne.s32.totalorder %s3363_s1, %s2479_s14  ;;  %p2484_p3 = scmp.lt.u32.totalorder %s3363_s1, %s3635_s2 }
 0x8a5   : > { %p2485_p5 = scmp.lt.u32.totalorder %s2483_s5, %s2479_s14  ;;  %p2487_p12 = scmp.lt.u32.totalorder %s2479_s14, %s3363_s1 }
 0x8a6   : > { %p2481_p8 = pnand %p2480_p4, %p2923_p10 }
 0x8a7   : > { %p2486_p7 = por %p2485_p5, %p2484_p3 }
 0x8a8   : > { %p2482_p6 = pneg %p2481_p8 }
 0x8a9   : > { %p2488_p1 = por %p2487_p12, %p2486_p7 }
 0x8ab   : > { %p2489_p2 = pnand %p2488_p1, %p2482_p6 }
 0x8ad   : > { %2492 = shalt.err (!%p2489_p2)
}
 0x8ae   : > { %2191 = dma.vmem_to_hbm [thread:$0]  (%p2923_p10), %s3367_s23, 64, %s3363_s1, %s3372_s19   ;;  %v830_v8 = vsub.f32 %v826_v3, %v793_v2  ;;  %v832_v13 = vsub.f32 %v828_v1, %v812_v11  ;;  %v806_v14 = vpop.permute.xlu1 %805 }
 0x8af   : > { %s1699_s6 = sshll.u32 %s3265_s27, 4  ;;  %s2054_s3 = sshll.u32 %s2777_s0, 9  ;;  %v814_v16 = vmul.f32 %v806_v14, %v798_v12  ;;  %s3400_s6 = int_to_ptr.vmem [resolvable:$true] %s1699_s6 }
 0x8b0   : > { %837 = vst.msk [vmem:[%s3265_s27 + $0x8] sm:$0xff] %vm835_vm0, %v832_v13  ;;  %s3638_s14 = sld [smem:[#allocation35_spill]]  ;;  %s1666_s1 = scalar_lea.sflag [#allocation4], %s2978_s20 }
 0x8b1   : > { %v834_v18 = vsub.f32 %v830_v8, %v814_v16  ;;  %s2493_s23 = scalar_lea.vmem %s3400_s6, 512  ;;  %s2658_s5 = smov [#allocation11]  }
 0x8b2   : > { %p2494_p13 = scmp.ne.s32.totalorder %s3400_s6, %s2493_s23  ;;  %s2497_s26 = sshll.u32 %s2658_s5, 4  ;;  %s2498_s26 = int_to_ptr.vmem [resolvable:$false] %s2497_s26 }
 0x8b3   : > { %839 = vst.msk [vmem:[%s3265_s27 + $0x18] sm:$0xff] %vm835_vm0, %v834_v18  ;;  %s2499_s2 = scalar_lea.vmem %s2498_s26, 1024  ;;  %p2500_p11 = scmp.lt.s32.totalorder %s3400_s6, %s2498_s26 }
 0x8b4   : > { %p2495_p9 = pnand %p2494_p13, %p2923_p10  ;;  %p2501_p4 = scmp.lt.s32.totalorder %s2499_s2, %s2493_s23 }
 0x8b6   : > { %s3405_s22 = scalar_lea.hbm %s3638_s14, %s2054_s3  ;;  %p2496_p0 = pneg %p2495_p9 }
 0x8b7   : > { %p2502_p8 = por %p2501_p4, %p2500_p11 }
 0x8b9   : > { %p2503_p6 = pnand %p2502_p8, %p2496_p0 }
 0x8bb   : > { %2506 = shalt.err (!%p2503_p6)
}
 0x8bc   : > { %s2507_s27 = scalar_lea.hbm %s3405_s22, 512  ;;  %s2511_s24 = scalar_lea.hbm %s3638_s14, 1024 }
 0x8bd   : > { %p2508_p3 = scmp.ne.s32.totalorder %s3405_s22, %s2507_s27  ;;  %p2512_p12 = scmp.lt.u32.totalorder %s3405_s22, %s3638_s14 }
 0x8be   : > { %p2513_p1 = scmp.lt.u32.totalorder %s2511_s24, %s2507_s27  ;;  %p2515_p13 = scmp.lt.u32.totalorder %s2507_s27, %s3405_s22 }
 0x8bf   : > { %p2509_p5 = pnand %p2508_p3, %p2923_p10 }
 0x8c0   : > { %p2514_p2 = por %p2513_p1, %p2512_p12 }
 0x8c1   : > { %p2510_p7 = pneg %p2509_p5 }
 0x8c2   : > { %p2516_p9 = por %p2515_p13, %p2514_p2 }
 0x8c4   : > { %p2517_p0 = pnand %p2516_p9, %p2510_p7 }
 0x8c6   : > { %2520 = shalt.err (!%p2517_p0)
}
 0x8c7   : > { %s3639_s2 = smov 128   ;;  %v1630_v19 = vrot.slane %v3144_v33, 6  ;;  %vm1629_vm15 = vcmask 1047554   ;;  %s3640_s3 = sld [smem:[#allocation31_spill]]  ;;  %v1658_v29 = vmul.f32 4.0, %v3144_v33  ;;  %v2030_v37 = vld [vmem:[%s3630_s15 + $0x18] sm:$0xff] }
 0x8c8   : > { %2188 = dma.vmem_to_hbm [thread:$0]  (%p2923_p10), %s3400_s6, 512, %s3405_s22, %s1666_s1, %s3639_s2, %s3639_s2, %s3633_s4   ;;  %vm1663_vm0 = vcmask 9216  }
 0x8c9   : > { %v1631_v24 = vsel %vm1629_vm15, %v1630_v19, %v3144_v33  ;;  %s2004_s4 = sshll.u32 %s2978_s20, 1  ;;  %s2002_s1 = sshll.u32 %s2978_s20, 3 }
 0x8ca   : > { %v1632_v26 = vrot.slane %v1631_v24, 6  ;;  %s2051_s27 = sshll.u32 %s2777_s0, 5  ;;  %s684_s25 = scalar_lea.vmem [#allocation17], %s2004_s4 }
 0x8cb   : > { %s1757_s24 = sshll.u32 %s684_s25, 4  ;;  %s2049_s20 = sshll.u32 %s2777_s0, 7  ;;  %s3467_s24 = int_to_ptr.vmem [resolvable:$true] %s1757_s24 }
 0x8cc   : > { %v1633_v63 = vsel %vm1629_vm15, %v1632_v26, %v3144_v33  ;;  %s3459_s6 = scalar_lea.vmem [#allocation14], %s2002_s1  ;;  %s3642_s1 = sld [smem:[#allocation37_spill]] }
 0x8cd   : > { %v1635_v6 = vrot.slane %v1633_v63, 1  ;;  %v1628_v27 = vld [vmem:[%s3640_s3] sm:$0x3]  ;;  %v2037_v10 = vld [vmem:[%s3640_s3 + $0x2] sm:$0x3]  ;;  %s1731_s22 = sshll.u32 %s3459_s6, 4  ;;  %s3477_s22 = int_to_ptr.vmem [resolvable:$true] %s1731_s22 }
 0x8ce   : > { %v2038_v31 = vld [vmem:[%s3640_s3 + $0x4] sm:$0x3]  ;;  %v2039_v34 = vld [vmem:[%s3640_s3 + $0x6] sm:$0x3]  ;;  %s3641_s3 = sld [smem:[#allocation39_spill]]  ;;  %s2521_s5 = scalar_lea.vmem %s3467_s24, 32 }
 0x8cf   : > { %v1637_v28 = vmul.f32 %v1635_v6, %v1628_v27  ;;  %v1640_v32 = vmul.f32 %v2037_v10, %v1635_v6  ;;  %p2522_p11 = scmp.ne.s32.totalorder %s3467_s24, %s2521_s5 }
 0x8d1   : > { %v1659_v30 = vsub.f32 %v1658_v29, %v1637_v28  ;;  %p2523_p4 = pnand %p2522_p11, %p2923_p10 }
 0x8d2   : > { %s3475_s23 = scalar_lea.hbm %s3642_s1, %s2049_s20 }
 0x8d3   : > { %v1660_v33 = vsub.f32 %v1659_v30, %v1640_v32  ;;  %p2524_p8 = pneg %p2523_p4 }
 0x8d4   : > { %s3465_s2 = scalar_lea.hbm %s3641_s3, %s2051_s27  ;;  %s2659_s27 = smov [#allocation17]  }
 0x8d5   : > { %s2525_s26 = sshll.u32 %s2659_s27, 4  ;;  %s2526_s26 = int_to_ptr.vmem [resolvable:$false] %s2525_s26 }
 0x8d6   : > { %s2527_s7 = scalar_lea.vmem %s2526_s26, 64  ;;  %p2528_p6 = scmp.lt.s32.totalorder %s3467_s24, %s2526_s26 }
 0x8d7   : > { %p2529_p3 = scmp.lt.s32.totalorder %s2527_s7, %s2521_s5 }
 0x8d9   : > { %p2530_p5 = por %p2529_p3, %p2528_p6 }
 0x8db   : > { %p2531_p7 = pnand %p2530_p5, %p2524_p8 }
 0x8df   : > { %v1652_v35 = vpop.permute.xlu0 %1651 }
 0x8e0   : > { %v1654_v36 = vmul.f32 %v2038_v31, %v1652_v35  ;;  %v1657_v21 = vmul.f32 %v2039_v34, %v1652_v35 }
 0x8e2   : > { %v1661_v4 = vsub.f32 %v1660_v33, %v1654_v36 }
 0x8e3   : > { %v1272_v20 = vpop.permute.xlu0 %1271 }
 0x8e4   : > { %v1662_v41 = vsub.f32 %v1661_v4, %v1657_v21  ;;  %v1274_v43 = vmul.f32 %v2030_v37, %v1272_v20 }
 0x8e6   : > { %v1279_v17 = vsub.f32 %v1278_v47, %v1274_v43  ;;  %1664 = vst.msk [vmem:[%s684_s25] sm:$0x3] %vm1663_vm0, %v1662_v41 }
 0x8e7   : > { %2534 = shalt.err (!%p2531_p7)
}
 0x8e8   : > { %s2535_s25 = scalar_lea.hbm %s3465_s2, 32  ;;  %s2539_s4 = scalar_lea.hbm %s3641_s3, 64 }
 0x8e9   : > { %p2536_p12 = scmp.ne.s32.totalorder %s3465_s2, %s2535_s25  ;;  %p2540_p13 = scmp.lt.u32.totalorder %s3465_s2, %s3641_s3 }
 0x8ea   : > { %p2541_p9 = scmp.lt.u32.totalorder %s2539_s4, %s2535_s25  ;;  %p2543_p11 = scmp.lt.u32.totalorder %s2535_s25, %s3465_s2 }
 0x8eb   : > { %p2537_p1 = pnand %p2536_p12, %p2923_p10 }
 0x8ec   : > { %p2542_p0 = por %p2541_p9, %p2540_p13 }
 0x8ed   : > { %p2538_p2 = pneg %p2537_p1 }
 0x8ee   : > { %p2544_p4 = por %p2543_p11, %p2542_p0 }
 0x8f0   : > { %p2545_p8 = pnand %p2544_p4, %p2538_p2 }
 0x8f2   : > { %2548 = shalt.err (!%p2545_p8)
}
 0x8f3   : > { %2192 = dma.vmem_to_hbm [thread:$0]  (%p2923_p10), %s3467_s24, 32, %s3465_s2, %s3372_s19   ;;  %1281 = vst.msk [vmem:[%s3459_s6] sm:$0xff] %vm1280_vm6, %v1279_v17 }
 0x8f4   : > { %s2549_s7 = scalar_lea.vmem %s3477_s22, 128  ;;  %s2660_s5 = smov [#allocation14]  }
 0x8f5   : > { %p2550_p6 = scmp.ne.s32.totalorder %s3477_s22, %s2549_s7  ;;  %s2553_s25 = sshll.u32 %s2660_s5, 4  ;;  %s2554_s25 = int_to_ptr.vmem [resolvable:$false] %s2553_s25 }
 0x8f6   : > { %s2555_s20 = scalar_lea.vmem %s2554_s25, 256  ;;  %p2556_p7 = scmp.lt.s32.totalorder %s3477_s22, %s2554_s25 }
 0x8f7   : > { %p2551_p3 = pnand %p2550_p6, %p2923_p10  ;;  %p2557_p12 = scmp.lt.s32.totalorder %s2555_s20, %s2549_s7 }
 0x8f9   : > { %p2552_p5 = pneg %p2551_p3  ;;  %p2558_p1 = por %p2557_p12, %p2556_p7 }
 0x8fb   : > { %p2559_p2 = pnand %p2558_p1, %p2552_p5 }
 0x8fd   : > { %2562 = shalt.err (!%p2559_p2)
}
 0x8fe   : > { %s2563_s19 = scalar_lea.hbm %s3475_s23, 128  ;;  %s2567_s2 = scalar_lea.hbm %s3642_s1, 256 }
 0x8ff   : > { %p2564_p13 = scmp.ne.s32.totalorder %s3475_s23, %s2563_s19  ;;  %p2568_p11 = scmp.lt.u32.totalorder %s3475_s23, %s3642_s1 }
 0x900   : > { %p2569_p4 = scmp.lt.u32.totalorder %s2567_s2, %s2563_s19  ;;  %p2571_p6 = scmp.lt.u32.totalorder %s2563_s19, %s3475_s23 }
 0x901   : > { %p2565_p9 = pnand %p2564_p13, %p2923_p10 }
 0x902   : > { %p2570_p8 = por %p2569_p4, %p2568_p11 }
 0x903   : > { %p2566_p0 = pneg %p2565_p9 }
 0x904   : > { %p2572_p3 = por %p2571_p6, %p2570_p8 }
 0x906   : > { %p2573_p5 = pnand %p2572_p3, %p2566_p0 }
 0x908   : > { %2576 = shalt.err (!%p2573_p5)
}
 0x909   : > { %2190 = dma.vmem_to_hbm [thread:$0]  (%p2923_p10), %s3477_s22, 128, %s3475_s23, %s3328_s21  }
 0x90a PF: > { %s3643_s27 = sld [smem:[#allocation24_spill]]  ;;  %s3644_s26 = sld [smem:[#allocation25_spill]] }
 0x90b   : > { %p3646_p12 = scmp.ge.s32.totalorder %s2631_s30, 2 }
 0x910   : > { %s1769_s7 = sand.u32 1, %s3643_s27   ;;  %p3645_p7 = scmp.ne.s32.totalorder %s3644_s26, 0 }
 0x911   : > { %s1770_s5 = scalar_lea.sflag [#allocation4], %s1769_s7 }
 0x912   : > { %p2216_p1 = pnand %p3646_p12, %p3645_p7 }
 0x914   : > { %2606 = dma.done.wait (!%p2216_p1), %s1770_s5, 512  }
 0x915   : > { %2608 = vsyncadd (!%p2216_p1), %s1770_s5, 4294966784  ;;  %s3647_s25 = sadd.s32 4294967294, %s2631_s30  }
 0x916   : > { %s1778_s20 = sand.u32 1, %s3647_s25  }
 0x917   : > { %s1779_s19 = scalar_lea.sflag [#allocation13], %s1778_s20 }
 0x918   : > { %2610 = dma.done.wait (!%p2216_p1), %s1779_s19, 384  }
 0x919   : > { %2612 = vsyncadd (!%p2216_p1), %s1779_s19, 4294966912  ;;  %s1797_s18 = scalar_lea.sflag [#allocation16], %s1778_s20 }
 0x91a   : > { %2614 = dma.done.wait (!%p2216_p1), %s1797_s18, 96  }
 0x91b   : > { %2616 = vsyncadd (!%p2216_p1), %s1797_s18, 4294967200  ;;  %p40_p10 = scmp.ge.s32.totalorder %s2913_s17, 4   ;;  %s3648_s27 = smov %s2623_s28 }
 0x91c   : > { %s3649_s28 = smov %s2627_s29  ;;  %s3650_s29 = smov %s2929_s13 }
 0x91d   : > { %s3651_s30 = smov %s2913_s17  ;;  %42 = sbr.rel (!%p40_p10) target bundleno = 26 (0x1a), region = 218 }
 0x924   :  { %1811 = vsyncpa [#allocation3], 1 }
 0x925   :  { %1813 = vsyncpa [#allocation3 + $0x1], 1 }
 0x926   :  { %1814 = vsyncpa [#allocation6], 1 }
 0x927   :  { %1815 = vsyncpa [#allocation9], 1 }
 0x928   :  { %1816 = vsyncpa [#allocation4], 1 }
 0x929   :  { %1818 = vsyncpa [#allocation4 + $0x1], 1 }
 0x92a   :  { %1819 = vsyncpa [#allocation13], 1 }
 0x92b   :  { %1821 = vsyncpa [#allocation13 + $0x1], 1 }
 0x92c   :  { %1822 = vsyncpa [#allocation16], 1 }
 0x92d   :  { %1824 = vsyncpa [#allocation16 + $0x1], 1 }

</bundles_post_ra>
